<compile_context>
chip_gen: v5e
topology: v5e:2x2
jax: 0.10.0
libtpu: 0.0.40
codegen_flags: <defaults>
</compile_context>

<pallas_src>
import functools

import jax
import jax.numpy as jnp
from jax.experimental import pallas as pl
from jax.experimental.pallas import tpu as pltpu


# ---------------------------------------------------------------------------
# Helpers
# ---------------------------------------------------------------------------

def _round_up(n, m):
    return ((n + m - 1) // m) * m


def _cdiv(a, b):
    return (a + b - 1) // b


def _choose_tile(batch, block_b):
    """Pick a lane/sublane-friendly batch tile.

    * batch <= 128: one full-array block (no alignment constraints, no padding).
    * otherwise: a multiple of 128 (lane-dense output blocks), capped at block_b,
      and clamped so the grid has >= 2 tiles (keeps both v7x TensorCores busy).
    """
    if batch <= 128:
        return batch
    tb = max(128, (min(block_b, batch) // 128) * 128)
    if _cdiv(batch, tb) < 2:
        tb = max(128, (_cdiv(batch, 2) // 128) * 128)
    return tb


# ---------------------------------------------------------------------------
# Fused Pallas kernel: full MLP forward on one batch tile
# ---------------------------------------------------------------------------

def _fused_mlp_kernel(*refs):
    """refs = (x, w1, b1, ..., wH, bH, w_head(1,Dh), b_head(SMEM,(1,)), out(1,1,TB)).

    Hidden layer:  h = ReLU(h @ W + b)      (eval-mode BN folded into next W/b,
                                             Dropout = identity in eval mode)
    Head (N=1):    out = sum(h * w_row, -1) + b   (VPU mul + XLU lane reduce,
                                                   stored lane-dense as (1,1,TB))
    Dots accumulate in f32 on the MXU; bias/ReLU/head math is f32 on the VPU.
    """
    x_ref = refs[0]
    o_ref = refs[-1]
    b_head_ref = refs[-2]          # SMEM scalar, shape (1,)
    w_head_ref = refs[-3]          # VMEM, shape (1, D_last), f32
    hidden_wb = refs[1:-3]
    n_hidden = len(hidden_wb) // 2
    compute_dtype = hidden_wb[0].dtype if n_hidden else x_ref.dtype

    h = x_ref[...]
    for li in range(n_hidden):
        w_ref = hidden_wb[2 * li]
        b_ref = hidden_wb[2 * li + 1]
        y = jnp.dot(h, w_ref[...], preferred_element_type=jnp.float32)
        y = y + b_ref[...]                              # (1, Dout) f32 broadcast
        h = jnp.maximum(y, 0.0).astype(compute_dtype)

    # Regression head: an N=1 matmul would waste the MXU and produce a lane-sparse
    # (TB, 1) column; do it on the VPU/XLU and store a lane-dense row instead.
    row = jnp.sum(h.astype(jnp.float32) * w_head_ref[...], axis=-1)   # (TB,)
    row = row + b_head_ref[0]
    o_ref[...] = row.astype(o_ref.dtype).reshape(o_ref.shape)


# ---------------------------------------------------------------------------
# Wrapper: batch-tiled, single launch, weights resident in VMEM
# ---------------------------------------------------------------------------

@functools.partial(
    jax.jit, static_argnames=("block_b", "compute_dtype", "vmem_limit_bytes"))
def simple_neural_net_forward(x, folded_params, *, block_b=2048,
                              compute_dtype=jnp.bfloat16,
                              vmem_limit_bytes=48 * 1024 * 1024):
    """x: (B, Din) f32; folded_params: list of {'w': (in,out), 'b': (1,out)}.

    Returns (B,) f32 — matches `self.network(x).squeeze()` in eval mode.
    block_b: sweep 512..4096 for large deployment batches (keep <= ~4096 and
    vmem_limit_bytes <= ~48 MiB on v7x; v5e/v6e can go to 64-96 MiB / TB 8192).
    """
    B, d_in = x.shape
    tb = _choose_tile(B, block_b)
    grid = _cdiv(B, tb)

    hidden = folded_params[:-1]
    head = folded_params[-1]

    operands = [x.astype(compute_dtype)]
    in_specs = [pl.BlockSpec((tb, d_in), lambda i: (i, 0))]       # streamed batch tiles
    for layer in hidden:
        w = layer["w"].astype(compute_dtype)
        # Note: with bf16 weights, layers with tiny running_var (large folded scale)
        # amplify quantization error slightly; accumulation stays f32.
        b = layer["b"].astype(jnp.float32)                        # (1, Dout), f32 math
        operands += [w, b]
        in_specs += [
            pl.BlockSpec(w.shape, lambda i: (0, 0)),              # VMEM-resident
            pl.BlockSpec(b.shape, lambda i: (0, 0)),
        ]

    w_head = head["w"].astype(jnp.float32).T                      # (1, D_last)
    b_head = head["b"].astype(jnp.float32).reshape((1,))          # scalar in SMEM
    operands += [w_head, b_head]
    in_specs += [
        pl.BlockSpec(w_head.shape, lambda i: (0, 0)),
        pl.BlockSpec(memory_space=pltpu.MemorySpace.SMEM),
    ]

    out = pl.pallas_call(
        _fused_mlp_kernel,
        out_shape=jax.ShapeDtypeStruct((grid, 1, tb), jnp.float32),
        grid=(grid,),
        in_specs=in_specs,
        out_specs=pl.BlockSpec((1, 1, tb), lambda i: (i, 0, 0)),   # lane-dense store
        compiler_params=pltpu.CompilerParams(
            dimension_semantics=("parallel",),     # v7x: shard batch tiles over 2 TCs
            vmem_limit_bytes=vmem_limit_bytes,
        ),
    )(*operands)

    # Ragged last tile produces garbage rows past B; slice them off.
    return out.reshape(-1)[:B]


# ---------------------------------------------------------------------------
# Parameter construction (deterministic) + BatchNorm folding
# ---------------------------------------------------------------------------

def init_raw_params(key, input_size, hidden_sizes, eps=1e-5):
    """Shapes/init matching the PyTorch module (weights stored as (in, out))."""
    params = []
    prev = input_size
    sizes = list(hidden_sizes) + [1]
    for i, h in enumerate(sizes):
        key, kw, kb = jax.random.split(key, 3)
        bound = float(prev) ** -0.5
        layer = dict(
            w=jax.random.uniform(kw, (prev, h), jnp.float32, -bound, bound),
            b=jax.random.uniform(kb, (h,), jnp.float32, -bound, bound),
        )
        if i < len(hidden_sizes):
            layer.update(
                gamma=jnp.ones((h,), jnp.float32),
                beta=jnp.zeros((h,), jnp.float32),
                running_mean=jnp.zeros((h,), jnp.float32),
                running_var=jnp.ones((h,), jnp.float32),
                eps=eps,
            )
        params.append(layer)
        prev = h
    return params


def fold_batchnorm(raw_params):
    """Fold each eval-mode BatchNorm affine (post-ReLU) into the NEXT Linear.

    z = y*scale + shift ; z @ W + b  ==  y @ (scale[:,None]*W) + (shift @ W + b)
    (ReLU precedes the affine, so it cannot fold into the producing layer.)
    """
    folded = []
    scale = shift = None
    for layer in raw_params:
        w, b = layer["w"], layer["b"]
        if scale is not None:
            b = shift @ w + b           # uses the ORIGINAL (unscaled) W
            w = scale[:, None] * w
        if "gamma" in layer:
            inv_std = layer["gamma"] / jnp.sqrt(layer["running_var"] + layer["eps"])
            scale = inv_std
            shift = layer["beta"] - layer["running_mean"] * inv_std
        else:
            scale = shift = None
        folded.append(dict(w=w, b=b.reshape(1, -1)))
    return folded


# ---------------------------------------------------------------------------
# Pure-JAX references
# ---------------------------------------------------------------------------

def reference_forward(x, raw_params):
    """Unfolded eval-mode forward (Linear -> ReLU -> BN(eval) -> Dropout=id)."""
    h = x
    for layer in raw_params[:-1]:
        h = jnp.maximum(h @ layer["w"] + layer["b"], 0.0)
        inv_std = layer["gamma"] / jnp.sqrt(layer["running_var"] + layer["eps"])
        h = (h - layer["running_mean"]) * inv_std + layer["beta"]
    out = h @ raw_params[-1]["w"] + raw_params[-1]["b"]
    return out[..., 0]


def reference_forward_folded(x, folded_params, compute_dtype):
    """Same math as the fused kernel (for bf16 validation)."""
    h = x.astype(compute_dtype)
    for layer in folded_params[:-1]:
        y = jnp.dot(h, layer["w"].astype(compute_dtype),
                    preferred_element_type=jnp.float32) + layer["b"]
        h = jnp.maximum(y, 0.0).astype(compute_dtype)
    last = folded_params[-1]
    y = jnp.sum(h.astype(jnp.float32) * last["w"].astype(jnp.float32).T, axis=-1)
    return y + last["b"].reshape(())


# TODO(synk): training-mode BatchNorm batch statistics and Dropout masking are not
# implemented; this reproduces eval()-mode forward semantics only.

if __name__ == "__main__":
    key = jax.random.PRNGKey(0)
    k_x, k_p = jax.random.split(key)

    input_size = 32
    hidden_sizes = [512, 256, 128]

    raw_params = init_raw_params(k_p, input_size, hidden_sizes)
    folded_params = fold_batchnorm(raw_params)

    # --- f32 path, batch=256: two 128-row tiles (exercises the parallel grid) ----
    x = jax.random.normal(k_x, (256, input_size), jnp.float32)
    out = jax.block_until_ready(
        simple_neural_net_forward(x, folded_params, compute_dtype=jnp.float32))
    ref = reference_forward(x, raw_params)
    assert out.shape == (256,), out.shape
    assert jnp.allclose(out, ref, atol=1e-3, rtol=1e-3), \
        float(jnp.max(jnp.abs(out - ref)))

    # --- bf16 path, ragged batch=200: non-divisible last tile, no input padding --
    x2 = jax.random.normal(k_x, (200, input_size), jnp.float32)
    out2 = jax.block_until_ready(
        simple_neural_net_forward(x2, folded_params, compute_dtype=jnp.bfloat16))
    ref2 = reference_forward_folded(x2, folded_params, jnp.bfloat16)
    assert out2.shape == (200,), out2.shape
    assert jnp.allclose(out2, ref2, atol=2e-2, rtol=2e-2), \
        float(jnp.max(jnp.abs(out2 - ref2)))

    # --- small batch (B <= 128): single full-array block path --------------------
    x3 = jax.random.normal(k_x, (40, input_size), jnp.float32)
    out3 = jax.block_until_ready(
        simple_neural_net_forward(x3, folded_params, compute_dtype=jnp.float32))
    ref3 = reference_forward(x3, raw_params)
    assert out3.shape == (40,), out3.shape
    assert jnp.allclose(out3, ref3, atol=1e-3, rtol=1e-3), \
        float(jnp.max(jnp.abs(out3 - ref3)))

    print("KERNEL_OK")
</pallas_src>

<mosaic_0001>
module attributes {stable_mosaic.version = 11 : i64} {
  func.func @_fused_mlp_kernel(%arg0: i32, %arg1: memref<128x32xf32, #tpu.memory_space<vmem>>, %arg2: memref<32x512xf32, #tpu.memory_space<vmem>>, %arg3: memref<1x512xf32, #tpu.memory_space<vmem>>, %arg4: memref<512x256xf32, #tpu.memory_space<vmem>>, %arg5: memref<1x256xf32, #tpu.memory_space<vmem>>, %arg6: memref<256x128xf32, #tpu.memory_space<vmem>>, %arg7: memref<1x128xf32, #tpu.memory_space<vmem>>, %arg8: memref<1x128xf32, #tpu.memory_space<vmem>>, %arg9: memref<1xf32, #tpu.memory_space<smem>>, %arg10: memref<1x1x128xf32, #tpu.memory_space<vmem>>) attributes {dimension_semantics = [#tpu.dimension_semantics<parallel>], iteration_bounds = array<i64: 2>, scalar_prefetch = 0 : i64, scratch_operands = 0 : i64, tpu.core_type = #tpu.core_type<tc>, window_params = [{transform_indices = @transform_0, window_bounds = array<i64: 128, 32>}, {pipeline_mode = #tpu.pipeline_mode<synchronous>, transform_indices = @transform_1, window_bounds = array<i64: 32, 512>}, {pipeline_mode = #tpu.pipeline_mode<synchronous>, transform_indices = @transform_2, window_bounds = array<i64: 1, 512>}, {pipeline_mode = #tpu.pipeline_mode<synchronous>, transform_indices = @transform_3, window_bounds = array<i64: 512, 256>}, {pipeline_mode = #tpu.pipeline_mode<synchronous>, transform_indices = @transform_4, window_bounds = array<i64: 1, 256>}, {pipeline_mode = #tpu.pipeline_mode<synchronous>, transform_indices = @transform_5, window_bounds = array<i64: 256, 128>}, {pipeline_mode = #tpu.pipeline_mode<synchronous>, transform_indices = @transform_6, window_bounds = array<i64: 1, 128>}, {pipeline_mode = #tpu.pipeline_mode<synchronous>, transform_indices = @transform_7, window_bounds = array<i64: 1, 128>}, {transform_indices = @transform_8, window_bounds = array<i64: 1>}, {transform_indices = @transform_9, window_bounds = array<i64: 1, 1, 128>}]} {
    %c0 = arith.constant 0 : index
    %c0_0 = arith.constant 0 : index
    %0 = vector.load %arg1[%c0, %c0_0] : memref<128x32xf32, #tpu.memory_space<vmem>>, vector<128x32xf32>
    %c0_1 = arith.constant 0 : index
    %c0_2 = arith.constant 0 : index
    %1 = vector.load %arg2[%c0_1, %c0_2] : memref<32x512xf32, #tpu.memory_space<vmem>>, vector<32x512xf32>
    %cst = arith.constant dense<0.000000e+00> : vector<128x512xf32>
    %2 = tpu.matmul %0, %1, %cst {dimension_numbers = #tpu.dot_dimension_numbers<[1], [0], [0], [1], [0, 0, 1, 1], [], []>} : vector<128x32xf32>, vector<32x512xf32>, vector<128x512xf32> -> vector<128x512xf32>
    %c0_3 = arith.constant 0 : index
    %c0_4 = arith.constant 0 : index
    %3 = vector.load %arg3[%c0_3, %c0_4] : memref<1x512xf32, #tpu.memory_space<vmem>>, vector<1x512xf32>
    %4 = vector.broadcast %3 : vector<1x512xf32> to vector<128x512xf32>
    %5 = arith.addf %2, %4 : vector<128x512xf32>
    %cst_5 = arith.constant 0.000000e+00 : f32
    %6 = vector.broadcast %cst_5 : f32 to vector<128x512xf32>
    %7 = arith.maximumf %5, %6 : vector<128x512xf32>
    %c0_6 = arith.constant 0 : index
    %c0_7 = arith.constant 0 : index
    %8 = vector.load %arg4[%c0_6, %c0_7] : memref<512x256xf32, #tpu.memory_space<vmem>>, vector<512x256xf32>
    %cst_8 = arith.constant dense<0.000000e+00> : vector<128x256xf32>
    %9 = tpu.matmul %7, %8, %cst_8 {dimension_numbers = #tpu.dot_dimension_numbers<[1], [0], [0], [1], [0, 0, 1, 1], [], []>} : vector<128x512xf32>, vector<512x256xf32>, vector<128x256xf32> -> vector<128x256xf32>
    %c0_9 = arith.constant 0 : index
    %c0_10 = arith.constant 0 : index
    %10 = vector.load %arg5[%c0_9, %c0_10] : memref<1x256xf32, #tpu.memory_space<vmem>>, vector<1x256xf32>
    %11 = vector.broadcast %10 : vector<1x256xf32> to vector<128x256xf32>
    %12 = arith.addf %9, %11 : vector<128x256xf32>
    %cst_11 = arith.constant 0.000000e+00 : f32
    %13 = vector.broadcast %cst_11 : f32 to vector<128x256xf32>
    %14 = arith.maximumf %12, %13 : vector<128x256xf32>
    %c0_12 = arith.constant 0 : index
    %c0_13 = arith.constant 0 : index
    %15 = vector.load %arg6[%c0_12, %c0_13] : memref<256x128xf32, #tpu.memory_space<vmem>>, vector<256x128xf32>
    %cst_14 = arith.constant dense<0.000000e+00> : vector<128x128xf32>
    %16 = tpu.matmul %14, %15, %cst_14 {dimension_numbers = #tpu.dot_dimension_numbers<[1], [0], [0], [1], [0, 0, 1, 1], [], []>} : vector<128x256xf32>, vector<256x128xf32>, vector<128x128xf32> -> vector<128x128xf32>
    %c0_15 = arith.constant 0 : index
    %c0_16 = arith.constant 0 : index
    %17 = vector.load %arg7[%c0_15, %c0_16] : memref<1x128xf32, #tpu.memory_space<vmem>>, vector<1x128xf32>
    %18 = vector.broadcast %17 : vector<1x128xf32> to vector<128x128xf32>
    %19 = arith.addf %16, %18 : vector<128x128xf32>
    %cst_17 = arith.constant 0.000000e+00 : f32
    %20 = vector.broadcast %cst_17 : f32 to vector<128x128xf32>
    %21 = arith.maximumf %19, %20 : vector<128x128xf32>
    %c0_18 = arith.constant 0 : index
    %c0_19 = arith.constant 0 : index
    %22 = vector.load %arg8[%c0_18, %c0_19] : memref<1x128xf32, #tpu.memory_space<vmem>>, vector<1x128xf32>
    %23 = vector.broadcast %22 : vector<1x128xf32> to vector<128x128xf32>
    %24 = arith.mulf %21, %23 : vector<128x128xf32>
    %cst_20 = arith.constant dense<0.000000e+00> : vector<128xf32>
    %25 = vector.multi_reduction <add>, %24, %cst_20 [1] : vector<128x128xf32> to vector<128xf32>
    %c0_21 = arith.constant 0 : index
    %26 = memref.load %arg9[%c0_21] : memref<1xf32, #tpu.memory_space<smem>>
    %27 = vector.broadcast %26 : f32 to vector<128xf32>
    %28 = arith.addf %25, %27 : vector<128xf32>
    %29 = vector.shape_cast %28 : vector<128xf32> to vector<1x1x128xf32>
    %c0_22 = arith.constant 0 : index
    %c0_23 = arith.constant 0 : index
    %c0_24 = arith.constant 0 : index
    %30 = vector.load %arg10[%c0_22, %c0_23, %c0_24] : memref<1x1x128xf32, #tpu.memory_space<vmem>>, vector<1x1x128xf32>
    tpu.vector_store %arg10[%c0_22, %c0_23, %c0_24], %29 {strides = array<i32>} : memref<1x1x128xf32, #tpu.memory_space<vmem>>, vector<1x1x128xf32>,
    return
  }
  func.func @transform_0(%arg0: i32) -> (i32, i32) {
    %c0_i32 = arith.constant 0 : i32
    %c0_i32_0 = arith.constant 0 : i32
    return %arg0, %c0_i32 : i32, i32
  }
  func.func @transform_1(%arg0: i32) -> (i32, i32) {
    %c0_i32 = arith.constant 0 : i32
    %c0_i32_0 = arith.constant 0 : i32
    %c0_i32_1 = arith.constant 0 : i32
    return %c0_i32, %c0_i32_0 : i32, i32
  }
  func.func @transform_2(%arg0: i32) -> (i32, i32) {
    %c0_i32 = arith.constant 0 : i32
    %c0_i32_0 = arith.constant 0 : i32
    %c0_i32_1 = arith.constant 0 : i32
    return %c0_i32, %c0_i32_0 : i32, i32
  }
  func.func @transform_3(%arg0: i32) -> (i32, i32) {
    %c0_i32 = arith.constant 0 : i32
    %c0_i32_0 = arith.constant 0 : i32
    %c0_i32_1 = arith.constant 0 : i32
    return %c0_i32, %c0_i32_0 : i32, i32
  }
  func.func @transform_4(%arg0: i32) -> (i32, i32) {
    %c0_i32 = arith.constant 0 : i32
    %c0_i32_0 = arith.constant 0 : i32
    %c0_i32_1 = arith.constant 0 : i32
    return %c0_i32, %c0_i32_0 : i32, i32
  }
  func.func @transform_5(%arg0: i32) -> (i32, i32) {
    %c0_i32 = arith.constant 0 : i32
    %c0_i32_0 = arith.constant 0 : i32
    %c0_i32_1 = arith.constant 0 : i32
    return %c0_i32, %c0_i32_0 : i32, i32
  }
  func.func @transform_6(%arg0: i32) -> (i32, i32) {
    %c0_i32 = arith.constant 0 : i32
    %c0_i32_0 = arith.constant 0 : i32
    %c0_i32_1 = arith.constant 0 : i32
    return %c0_i32, %c0_i32_0 : i32, i32
  }
  func.func @transform_7(%arg0: i32) -> (i32, i32) {
    %c0_i32 = arith.constant 0 : i32
    %c0_i32_0 = arith.constant 0 : i32
    %c0_i32_1 = arith.constant 0 : i32
    return %c0_i32, %c0_i32_0 : i32, i32
  }
  func.func @transform_8(%arg0: i32) -> i32 {
    %c0_i32 = arith.constant 0 : i32
    %c0_i32_0 = arith.constant 0 : i32
    return %c0_i32 : i32
  }
  func.func @transform_9(%arg0: i32) -> (i32, i32, i32) {
    %c0_i32 = arith.constant 0 : i32
    %c0_i32_0 = arith.constant 0 : i32
    %c0_i32_1 = arith.constant 0 : i32
    return %arg0, %c0_i32, %c0_i32_0 : i32, i32, i32
  }
}

</mosaic_0001>

<bundles_post_ra>
// kernel: simple_neural_net_forward.1
= control target key start
LH: loop header
LB: loop body
LE: loop exit
PB: predicated region body
PF: predicated region fallthrough
CT: control target
= control target key end

     0   :  { %s3543_s0 = inlined_call_operand.vmem [shape: f32[256,32], index: 0, kind: input, shape index: {}]   ;;  %s3544_s1 = inlined_call_operand.hbm [shape: f32[32,512], index: 1, kind: input, shape index: {}]   ;;  %s3545_s2 = inlined_call_operand.vmem [shape: f32[1,512], index: 2, kind: input, shape index: {}]   ;;  %s3546_s3 = inlined_call_operand.hbm [shape: f32[512,256], index: 3, kind: input, shape index: {}]   ;;  %s3547_s4 = inlined_call_operand.vmem [shape: f32[1,256], index: 4, kind: input, shape index: {}]   ;;  %s3548_s5 = inlined_call_operand.vmem [shape: f32[256,128], index: 5, kind: input, shape index: {}]   ;;  %s3549_s6 = inlined_call_operand.vmem [shape: f32[1,128], index: 6, kind: input, shape index: {}]   ;;  %s3550_s7 = inlined_call_operand.vmem [shape: f32[1,128], index: 7, kind: input, shape index: {}]   ;;  %s3551_s8 = inlined_call_operand.<no memory space> [shape: f32[1], index: 8, kind: input, shape index: {}]   ;;  %s3552_s9 = inlined_call_operand.hbm [shape: f32[2,1,128], index: 9, kind: output, shape index: {}]  }
   0x1   :  { %14 = sst [smem:[#allocation2]] %s3551_s8 }
   0x2   :  { %15 = vsyncpa [#allocation4], 0 }
   0x3   :  { %16 = vsyncpa [#allocation7], 0 }
   0x4   :  { %17 = vsyncpa [#allocation5], 0 }
   0x5   :  { %19 = vsyncpa [#allocation5 + $0x1], 0  ;;  %s2232_s11 = smov 0   ;;  %s2234_s12 = smov 0  }
   0x6   :  { %s2236_s13 = smov 0   ;;  %s2238_s14 = smov 0  }
   0x7 LB: > { %s2253_s8 = sadd.s32 4294967295, %s2171_s14   ;;  %s1891_s15 = sadd.s32 4294967294, %s2171_s14   ;;  %s2171_s14 = sphi %s2238_s14, %s3696_s14   ;;  %s2167_s13 = sphi %s2236_s13, %s3695_s13   ;;  %s2163_s12 = sphi %s2234_s12, %s3694_s12   ;;  %s2159_s11 = sphi %s2232_s11, %s3693_s11  }
   0x8   : > { %s2257_s16 = sadd.s32 1, %s2171_s14   ;;  %s226_s17 = sadd.s32 1, %s2167_s13 }
   0x9   : > { %s223_s18 = ssub.s32 %s2171_s14, %s2257_s16  ;;  %p236_p0 = scmp.ne.s32.totalorder %s2167_s13, %s2163_s12 }
   0xa   : > { %p224_p1 = scmp.eq.s32.totalorder %s223_s18, 0  ;;  %p237_p2 = scmp.eq.s32.totalorder %s2253_s8, 1 }
   0xb   : > { %p242_p3 = scmp.ne.s32.totalorder %s2163_s12, %s2159_s11  ;;  %p243_p4 = scmp.eq.s32.totalorder %s1891_s15, 1 }
   0xc   : > { %s2268_s19 = scalar_select %p224_p1, %s2167_s13, %s226_s17  }
   0xd   : > { %p2270_p5 = por %p237_p2, %p236_p0  ;;  %p2274_p6 = por %p243_p4, %p242_p3 }
   0xe   : > { %p1892_p7 = scmp.ge.s32.totalorder %s2171_s14, 1  ;;  %p250_p8 = scmp.lt.s32.totalorder %s2171_s14, 3 }
   0xf   : > { %p1996_p9 = scmp.eq.s32.totalorder %s2253_s8, 0  ;;  %s261_s25 = sshll.u32 %s3544_s1, 4  ;;  %s262_s25 = int_to_ptr.hbm [resolvable:$true] %s261_s25 }
  0x10   : > { %p2281_p10 = pnand %p1892_p7, %p250_p8  ;;  %s2173_s26 = smov [#allocation3]  }
  0x11   : > { %s263_s27 = sshll.u32 %s2173_s26, 4  ;;  %s278_s30 = sshll.u32 %s3546_s3, 4  ;;  %s264_s27 = int_to_ptr.vmem [resolvable:$true] %s263_s27  ;;  %s279_s30 = int_to_ptr.hbm [resolvable:$true] %s278_s30 }
  0x12   : > { %p1985_p11 = pneg %p2281_p10  ;;  %s2174_s10 = smov 512  }
  0x13   : > { %s2175_s15 = smov 32   ;;  %s2176_s17 = smov [#allocation6]  }
  0x14   : > { %p1986_p12 = pnand %p1996_p9, %p1985_p11  ;;  %s280_s18 = sshll.u32 %s2176_s17, 4  ;;  %s281_s18 = int_to_ptr.vmem [resolvable:$true] %s280_s18 }
  0x15   : > { %s2177_s23 = smov 256   ;;  %s2178_s24 = smov 16  }
  0x16   : > { %1988 = dma.hbm_to_vmem [thread:$0]  (!%p1986_p12), %s262_s25, 2048, %s264_s27, [#allocation4], %s2174_s10, %s2174_s10, %s2175_s15  }
  0x17   : > { %1991 = dma.hbm_to_vmem [thread:$0]  (!%p1986_p12), %s279_s30, 16384, %s281_s18, [#allocation7], %s2177_s23, %s2177_s23, %s2178_s24  }
  0x18   : > { %320 = sbr.rel (%p2281_p10) target bundleno = 883 (0x373), region = 56 }
  0x1d   : > { %2146 = dma.done.wait (%p1996_p9), [#allocation4], 2048  }
  0x1e   : > { %2148 = vsyncadd (%p1996_p9), [#allocation4], 4294965248 }
  0x1f   : > { %2150 = dma.done.wait (%p1996_p9), [#allocation7], 16384  }
  0x20   : > { %2152 = vsyncadd (%p1996_p9), [#allocation7], 4294950912  ;;  %s1899_s25 = sshll.u32 %s2253_s8, 4  ;;  %v395_v0 = vld [vmem:[#allocation3 + $0x60] sm:$0xff]  ;;  %v396_v1 = vld [vmem:[#allocation3 + $0x68] sm:$0xff]  ;;  %vm409_vm0 = vcmask 261120   ;;  %s1810_s27 = scalar_lea.hbm %s3552_s9, %s2253_s8 }
  0x21   : > { %p362_p13 = scmp.lt.s32.totalorder %s1899_s25, 31  ;;  %v391_v2 = vld [vmem:[#allocation3 + $0x40] sm:$0xff]  ;;  %470 = vmatpush.msra.mxu0 %v395_v0  ;;  %1967 = vmatpush.msra.mxu2 %v395_v0  ;;  %v392_v3 = vld [vmem:[#allocation3 + $0x48] sm:$0xff]  ;;  %v397_v10 = vld [vmem:[#allocation3 + $0x70] sm:$0xff]  ;;  %s1702_s24 = sld [smem:[#allocation2]]  ;;  %vm1741_vm1 = vcmask 130112  }
  0x22   : > { %535 = vmatpush.msra.mxu1 %v396_v1  ;;  %1971 = vmatpush.msra.mxu3 %v396_v1  ;;  %v387_v4 = vld [vmem:[#allocation3 + $0x20] sm:$0xff]  ;;  %v388_v5 = vld [vmem:[#allocation3 + $0x28] sm:$0xff]  ;;  %v398_v11 = vld [vmem:[#allocation3 + $0x78] sm:$0xff]  ;;  %vm1745_vm2 = vcmask 195712   ;;  %vm1749_vm3 = vcmask 261312   ;;  %vm1753_vm4 = vcmask 326912  }
  0x23   : > { %s3698_s25 = smov (!%p362_p13, %s1899_s25), 31  ;;  %471 = vmatpush.msra.mxu0 %v391_v2  ;;  %1968 = vmatpush.msra.mxu2 %v391_v2  ;;  %v383_v6 = vld [vmem:[#allocation3] sm:$0xff]  ;;  %v384_v7 = vld [vmem:[#allocation3 + $0x8] sm:$0xff]  ;;  %v393_v12 = vld [vmem:[#allocation3 + $0x50] sm:$0xff]  ;;  %vm1757_vm5 = vcmask 392512   ;;  %vm1761_vm6 = vcmask 458112  }
  0x24   : > { %s1900_s22 = sshll.u32 %s3698_s25, 3  ;;  %536 = vmatpush.msra.mxu1 %v392_v3  ;;  %1972 = vmatpush.msra.mxu3 %v392_v3  ;;  %v394_v13 = vld [vmem:[#allocation3 + $0x58] sm:$0xff]  ;;  %v389_v14 = vld [vmem:[#allocation3 + $0x30] sm:$0xff]  ;;  %v874_v32 = vld [vmem:[#allocation6 + $0x2e0] sm:$0xff]  ;;  %vm1765_vm7 = vcmask 523712   ;;  %vm1769_vm8 = vcmask 589312  }
  0x25   : > { %s2309_s28 = scalar_lea.vmem %s3543_s0, %s1900_s22  ;;  %472 = vmatpush.msra.mxu0 %v387_v4  ;;  %1969 = vmatpush.msra.mxu2 %v387_v4  ;;  %v390_v15 = vld [vmem:[#allocation3 + $0x38] sm:$0xff]  ;;  %v385_v20 = vld [vmem:[#allocation3 + $0x10] sm:$0xff]  ;;  %v906_v33 = vld [vmem:[#allocation6 + $0x3e0] sm:$0xff]  ;;  %vm1773_vm9 = vcmask 654912   ;;  %s359_s25 = sand.u32 1, %s2163_s12   ;;  %vm1777_vm10 = vcmask 720512  }
  0x26   : > { %537 = vmatpush.msra.mxu1 %v388_v5  ;;  %1973 = vmatpush.msra.mxu3 %v388_v5  ;;  %v2312_v8 = vld [vmem:[%s2309_s28] sm:$0xff]  ;;  %v2326_v16 = vld [vmem:[%s2309_s28 + $0x8] sm:$0xff]  ;;  %v2340_v18 = vld [vmem:[%s2309_s28 + $0x10] sm:$0xff]  ;;  %vm1781_vm11 = vcmask 786112   ;;  %vm1785_vm12 = vcmask 851712   ;;  %vm1789_vm13 = vcmask 917312  }
  0x27   : > { %v2315_v9 = vld [vmem:[%s2309_s28 + $0x40] sm:$0xff]  ;;  %473 = vmatpush.msra.mxu0 %v383_v6  ;;  %1970 = vmatpush.msra.mxu2 %v383_v6  ;;  %v2329_v17 = vld [vmem:[%s2309_s28 + $0x48] sm:$0xff]  ;;  %v2343_v19 = vld [vmem:[%s2309_s28 + $0x50] sm:$0xff]  ;;  %vm1793_vm14 = vcmask 982912   ;;  %s1814_s8 = sshll.u32 %s1810_s27, 4  ;;  %vm1797_vm15 = vcmask 1048512   ;;  %s1815_s8 = int_to_ptr.hbm [resolvable:$true] %s1814_s8 }
  0x28   : > { %538 = vmatpush.msra.mxu1 %v384_v7  ;;  %1974 = vmatpush.msra.mxu3 %v384_v7  ;;  %v386_v21 = vld [vmem:[#allocation3 + $0x18] sm:$0xff]  ;;  %v2368_v24 = vld [vmem:[%s2309_s28 + $0x20] sm:$0xff]  ;;  %v2382_v26 = vld [vmem:[%s2309_s28 + $0x28] sm:$0xff]  ;;  %s1802_s30 = scalar_lea.sflag [#allocation5], %s359_s25  ;;  %s2115_s10 = sshra.s32 %s1815_s8, 4  ;;  %s2116_s10 = int_to_ptr.hbm [resolvable:$true] %s2115_s10 }
  0x29   : > { %1901 = vmatmul.msk.f32.vlgmr.msra.gmra.mxu0 %vm409_vm0, %v2312_v8  ;;  %1909 = vmatmul.msk.f32.vlgmr.msra.gmra.mxu2 %vm409_vm0, %v2315_v9  ;;  %v2354_v22 = vld [vmem:[%s2309_s28 + $0x18] sm:$0xff]  ;;  %v2371_v25 = vld [vmem:[%s2309_s28 + $0x60] sm:$0xff]  ;;  %v2385_v27 = vld [vmem:[%s2309_s28 + $0x68] sm:$0xff]  ;;  %s2117_s15 = scalar_lea.hbm %s2116_s10, 1  ;;  %s2121_s23 = scalar_lea.hbm %s3552_s9, 2 }
  0x2a   : > { %1917 = vmatmul.msk.f32.vlgmr.msra.gmra.mxu1 %vm409_vm0, %v2312_v8  ;;  %1925 = vmatmul.msk.f32.vlgmr.msra.gmra.mxu3 %vm409_vm0, %v2315_v9  ;;  %v2357_v23 = vld [vmem:[%s2309_s28 + $0x58] sm:$0xff]  ;;  %v876_v28 = vld [vmem:[#allocation6 + $0x2f0] sm:$0xff]  ;;  %v870_v38 = vld [vmem:[#allocation6 + $0x2c0] sm:$0xff]  ;;  %p2118_p0 = scmp.ne.s32.totalorder %s2116_s10, %s2117_s15  ;;  %p2122_p3 = scmp.lt.s32.totalorder %s2116_s10, %s3552_s9 }
  0x2b   : > { %600 = vmatpush.msrb.mxu2 %v397_v10  ;;  %665 = vmatpush.msrb.mxu3 %v398_v11  ;;  %v908_v29 = vld [vmem:[#allocation6 + $0x3f0] sm:$0xff]  ;;  %v2410_v34 = vld [vmem:[%s2309_s28 + $0x38] sm:$0xff]  ;;  %v902_v39 = vld [vmem:[#allocation6 + $0x3c0] sm:$0xff]  ;;  %p2123_p4 = scmp.lt.s32.totalorder %s2121_s23, %s2117_s15 }
  0x2c   : > { %v2396_v30 = vld [vmem:[%s2309_s28 + $0x30] sm:$0xff]  ;;  %v2413_v35 = vld [vmem:[%s2309_s28 + $0x78] sm:$0xff]  ;;  %v810_v42 = vld [vmem:[#allocation6 + $0xe0] sm:$0xff]  ;;  %p2119_p1 = pnand %p2118_p0, %p2270_p5 }
  0x2d   : > { %601 = vmatpush.msrb.mxu2 %v393_v12  ;;  %666 = vmatpush.msrb.mxu3 %v394_v13  ;;  %v2399_v31 = vld [vmem:[%s2309_s28 + $0x70] sm:$0xff]  ;;  %v842_v43 = vld [vmem:[#allocation6 + $0x1e0] sm:$0xff]  ;;  %s360_s28 = scalar_lea.vmem [#allocation8], %s359_s25  ;;  %p2124_p7 = por %p2123_p4, %p2122_p3 }
  0x2e   : > { %v872_v36 = vld [vmem:[#allocation6 + $0x2d0] sm:$0xff]  ;;  %v806_v47 = vld [vmem:[#allocation6 + $0xc0] sm:$0xff]  ;;  %s1812_s29 = sshll.u32 %s360_s28, 4  ;;  %p2120_p2 = pneg %p2119_p1  ;;  %s1813_s29 = int_to_ptr.vmem [resolvable:$true] %s1812_s29 }
  0x2f   : > { %602 = vmatpush.msrb.mxu2 %v389_v14  ;;  %667 = vmatpush.msrb.mxu3 %v390_v15  ;;  %v904_v37 = vld [vmem:[#allocation6 + $0x3d0] sm:$0xff]  ;;  %v838_v48 = vld [vmem:[#allocation6 + $0x1c0] sm:$0xff] }
  0x30   : > { %v812_v40 = vld [vmem:[#allocation6 + $0xf0] sm:$0xff]  ;;  %v802_v52 = vld [vmem:[#allocation6 + $0xa0] sm:$0xff]  ;;  %p2125_p8 = pnand %p2124_p7, %p2120_p2 }
  0x31   : > { %1902 = vmatmul.msk.f32.gmra.mxu0 %vm409_vm0, %v2326_v16  ;;  %1910 = vmatmul.msk.f32.gmra.mxu2 %vm409_vm0, %v2329_v17  ;;  %v844_v41 = vld [vmem:[#allocation6 + $0x1f0] sm:$0xff]  ;;  %v834_v53 = vld [vmem:[#allocation6 + $0x1a0] sm:$0xff] }
  0x32   : > { %1918 = vmatmul.msk.f32.gmra.mxu1 %vm409_vm0, %v2326_v16  ;;  %1926 = vmatmul.msk.f32.gmra.mxu3 %vm409_vm0, %v2329_v17  ;;  %v808_v44 = vld [vmem:[#allocation6 + $0xd0] sm:$0xff]  ;;  %v866_v56 = vld [vmem:[#allocation6 + $0x2a0] sm:$0xff] }
  0x33   : > { %603 = vmatpush.msrb.mxu2 %v385_v20  ;;  %668 = vmatpush.msrb.mxu3 %v386_v21  ;;  %v840_v45 = vld [vmem:[#allocation6 + $0x1d0] sm:$0xff]  ;;  %v798_v57 = vld [vmem:[#allocation6 + $0x80] sm:$0xff] }
  0x34   : > { %916 = vmatpush.msrb.mxu0 %v812_v40  ;;  %981 = vmatpush.msrb.mxu1 %v844_v41  ;;  %v868_v46 = vld [vmem:[#allocation6 + $0x2b0] sm:$0xff]  ;;  %v830_v58 = vld [vmem:[#allocation6 + $0x180] sm:$0xff] }
  0x35   : > { %1046 = vmatpush.msra.mxu2 %v876_v28  ;;  %1111 = vmatpush.msra.mxu3 %v908_v29  ;;  %v900_v49 = vld [vmem:[#allocation6 + $0x3b0] sm:$0xff]  ;;  %v898_v59 = vld [vmem:[#allocation6 + $0x3a0] sm:$0xff] }
  0x36   : > { %917 = vmatpush.msrb.mxu0 %v810_v42  ;;  %982 = vmatpush.msrb.mxu1 %v842_v43  ;;  %v804_v50 = vld [vmem:[#allocation6 + $0xb0] sm:$0xff]  ;;  %v794_v62 = vld [vmem:[#allocation6 + $0x60] sm:$0xff] }
  0x37   : > { %1047 = vmatpush.msra.mxu2 %v874_v32  ;;  %1112 = vmatpush.msra.mxu3 %v906_v33  ;;  %v836_v51 = vld [vmem:[#allocation6 + $0x1b0] sm:$0xff]  ;;  %v826_v63 = vld [vmem:[#allocation6 + $0x160] sm:$0xff] }
  0x38   : > { %918 = vmatpush.msrb.mxu0 %v808_v44  ;;  %983 = vmatpush.msrb.mxu1 %v840_v45  ;;  %v800_v54 = vld [vmem:[#allocation6 + $0x90] sm:$0xff]  ;;  %v790_v3 = vld [vmem:[#allocation6 + $0x40] sm:$0xff] }
  0x39   : > { %1903 = vmatmul.msk.f32.gmra.mxu0 %vm409_vm0, %v2340_v18  ;;  %1911 = vmatmul.msk.f32.gmra.mxu2 %vm409_vm0, %v2343_v19  ;;  %v832_v55 = vld [vmem:[#allocation6 + $0x190] sm:$0xff]  ;;  %v822_v4 = vld [vmem:[#allocation6 + $0x140] sm:$0xff] }
  0x3a   : > { %1919 = vmatmul.msk.f32.gmra.mxu1 %vm409_vm0, %v2340_v18  ;;  %1927 = vmatmul.msk.f32.gmra.mxu3 %vm409_vm0, %v2343_v19  ;;  %v796_v60 = vld [vmem:[#allocation6 + $0x70] sm:$0xff]  ;;  %v818_v10 = vld [vmem:[#allocation6 + $0x120] sm:$0xff] }
  0x3b   : > { %1048 = vmatpush.msra.mxu2 %v872_v36  ;;  %1113 = vmatpush.msra.mxu3 %v904_v37  ;;  %v828_v61 = vld [vmem:[#allocation6 + $0x170] sm:$0xff]  ;;  %v862_v13 = vld [vmem:[#allocation6 + $0x280] sm:$0xff] }
  0x3c   : > { %919 = vmatpush.msrb.mxu0 %v806_v47  ;;  %984 = vmatpush.msrb.mxu1 %v838_v48  ;;  %v792_v0 = vld [vmem:[#allocation6 + $0x50] sm:$0xff]  ;;  %v782_v14 = vld [vmem:[#allocation6] sm:$0xff] }
  0x3d   : > { %1049 = vmatpush.msra.mxu2 %v870_v38  ;;  %1114 = vmatpush.msra.mxu3 %v902_v39  ;;  %v824_v1 = vld [vmem:[#allocation6 + $0x150] sm:$0xff]  ;;  %v814_v15 = vld [vmem:[#allocation6 + $0x100] sm:$0xff] }
  0x3e   : > { %920 = vmatpush.msrb.mxu0 %v804_v50  ;;  %985 = vmatpush.msrb.mxu1 %v836_v51  ;;  %v864_v2 = vld [vmem:[#allocation6 + $0x290] sm:$0xff]  ;;  %v858_v21 = vld [vmem:[#allocation6 + $0x260] sm:$0xff] }
  0x3f   : > { %1050 = vmatpush.msra.mxu2 %v868_v46  ;;  %1115 = vmatpush.msra.mxu3 %v900_v49  ;;  %v896_v5 = vld [vmem:[#allocation6 + $0x390] sm:$0xff]  ;;  %v854_v39 = vld [vmem:[#allocation6 + $0x240] sm:$0xff] }
  0x40   : > { %921 = vmatpush.msrb.mxu0 %v802_v52  ;;  %986 = vmatpush.msrb.mxu1 %v834_v53  ;;  %v788_v6 = vld [vmem:[#allocation6 + $0x30] sm:$0xff]  ;;  %v886_v41 = vld [vmem:[#allocation6 + $0x340] sm:$0xff] }
  0x41   : > { %1904 = vmatmul.msk.f32.gmra.mxu0 %vm409_vm0, %v2354_v22  ;;  %1912 = vmatmul.msk.f32.gmra.mxu2 %vm409_vm0, %v2357_v23  ;;  %v820_v7 = vld [vmem:[#allocation6 + $0x130] sm:$0xff] }
  0x42   : > { %1920 = vmatmul.msk.f32.gmra.mxu1 %vm409_vm0, %v2354_v22  ;;  %1928 = vmatmul.msk.f32.gmra.mxu3 %vm409_vm0, %v2357_v23  ;;  %v784_v11 = vld [vmem:[#allocation6 + $0x10] sm:$0xff] }
  0x43   : > { %922 = vmatpush.msrb.mxu0 %v800_v54  ;;  %987 = vmatpush.msrb.mxu1 %v832_v55  ;;  %v816_v12 = vld [vmem:[#allocation6 + $0x110] sm:$0xff] }
  0x44   : > { %1051 = vmatpush.msra.mxu2 %v866_v56  ;;  %1116 = vmatpush.msra.mxu3 %v898_v59  ;;  %v892_v20 = vld [vmem:[#allocation6 + $0x370] sm:$0xff]  ;;  %v882_v59 = vld [vmem:[#allocation6 + $0x320] sm:$0xff] }
  0x45   : > { %923 = vmatpush.msrb.mxu0 %v798_v57  ;;  %988 = vmatpush.msrb.mxu1 %v830_v58  ;;  %v852_v48 = vld [vmem:[#allocation6 + $0x230] sm:$0xff]  ;;  %v850_v57 = vld [vmem:[#allocation6 + $0x220] sm:$0xff] }
  0x46   : > { %1052 = vmatpush.msra.mxu2 %v864_v2  ;;  %1117 = vmatpush.msra.mxu3 %v896_v5  ;;  %v884_v50 = vld [vmem:[#allocation6 + $0x330] sm:$0xff] }
  0x47   : > { %924 = vmatpush.msrb.mxu0 %v796_v60  ;;  %989 = vmatpush.msrb.mxu1 %v828_v61  ;;  %v848_v2 = vld [vmem:[#allocation6 + $0x210] sm:$0xff] }
  0x48   : > { %1053 = vmatpush.msra.mxu2 %v862_v13 }
  0x49   : > { %1905 = vmatmul.msk.f32.gmra.mxu0 %vm409_vm0, %v2368_v24  ;;  %1913 = vmatmul.msk.f32.gmra.mxu2 %vm409_vm0, %v2371_v25 }
  0x4a   : > { %1921 = vmatmul.msk.f32.gmra.mxu1 %vm409_vm0, %v2368_v24  ;;  %1929 = vmatmul.msk.f32.gmra.mxu3 %vm409_vm0, %v2371_v25 }
  0x4b   : > { %925 = vmatpush.msrb.mxu0 %v794_v62  ;;  %990 = vmatpush.msrb.mxu1 %v826_v63 }
  0x4d   : > { %926 = vmatpush.msrb.mxu0 %v792_v0  ;;  %991 = vmatpush.msrb.mxu1 %v824_v1 }
  0x4f   : > { %927 = vmatpush.msrb.mxu0 %v790_v3  ;;  %992 = vmatpush.msrb.mxu1 %v822_v4  ;;  %v880_v4 = vld [vmem:[#allocation6 + $0x310] sm:$0xff] }
  0x51   : > { %1906 = vmatmul.msk.f32.gmra.mxu0 %vm409_vm0, %v2382_v26  ;;  %1914 = vmatmul.msk.f32.gmra.mxu2 %vm409_vm0, %v2385_v27 }
  0x52   : > { %1922 = vmatmul.msk.f32.gmra.mxu1 %vm409_vm0, %v2382_v26  ;;  %1930 = vmatmul.msk.f32.gmra.mxu3 %vm409_vm0, %v2385_v27 }
  0x53   : > { %928 = vmatpush.msrb.mxu0 %v788_v6  ;;  %993 = vmatpush.msrb.mxu1 %v820_v7  ;;  %v846_v7 = vld [vmem:[#allocation6 + $0x200] sm:$0xff] }
  0x55   : > { %994 = vmatpush.msrb.mxu1 %v818_v10 }
  0x57   : > { %995 = vmatpush.msrb.mxu1 %v816_v12 }
  0x59   : > { %1907 = vmatmul.msk.f32.gmra.mxu0 %vm409_vm0, %v2396_v30  ;;  %1915 = vmatmul.msk.f32.gmra.mxu2 %vm409_vm0, %v2399_v31 }
  0x5a   : > { %1923 = vmatmul.msk.f32.gmra.mxu1 %vm409_vm0, %v2396_v30  ;;  %1931 = vmatmul.msk.f32.gmra.mxu3 %vm409_vm0, %v2399_v31 }
  0x5b   : > { %996 = vmatpush.msrb.mxu1 %v814_v15 }
  0x61   : > { %1908 = vmatmul.msk.f32.gmra.mxu0 %vm409_vm0, %v2410_v34  ;;  %1916 = vmatmul.msk.f32.gmra.mxu2 %vm409_vm0, %v2413_v35 }
  0x62   : > { %1924 = vmatmul.msk.f32.gmra.mxu1 %vm409_vm0, %v2410_v34  ;;  %1932 = vmatmul.msk.f32.gmra.mxu3 %vm409_vm0, %v2413_v35 }
  0x69   : > { %1933 = vmatmul.msk.f32.vlgmr.msrb.gmra.mxu2 %vm409_vm0, %v2312_v8 }
  0x6a   : > { %1949 = vmatmul.msk.f32.vlgmr.msrb.gmra.mxu3 %vm409_vm0, %v2312_v8  ;;  %v786_v8 = vld [vmem:[#allocation6 + $0x20] sm:$0xff] }
  0x6b   : > { %929 = vmatpush.msrb.mxu0 %v786_v8 }
  0x6d   : > { %930 = vmatpush.msrb.mxu0 %v784_v11 }
  0x6f   : > { %931 = vmatpush.msrb.mxu0 %v782_v14  ;;  %v878_v14 = vld [vmem:[#allocation6 + $0x300] sm:$0xff] }
  0x71   : > { %1934 = vmatmul.msk.f32.gmra.mxu2 %vm409_vm0, %v2326_v16 }
  0x72   : > { %1950 = vmatmul.msk.f32.gmra.mxu3 %vm409_vm0, %v2326_v16  ;;  %v894_v16 = vld [vmem:[#allocation6 + $0x380] sm:$0xff] }
  0x73   : > { %1118 = vmatpush.msra.mxu3 %v894_v16 }
  0x75   : > { %1119 = vmatpush.msra.mxu3 %v892_v20 }
  0x79   : > { %1935 = vmatmul.msk.f32.gmra.mxu2 %vm409_vm0, %v2340_v18 }
  0x7a   : > { %1951 = vmatmul.msk.f32.gmra.mxu3 %vm409_vm0, %v2340_v18  ;;  %v860_v18 = vld [vmem:[#allocation6 + $0x270] sm:$0xff] }
  0x7b   : > { %1054 = vmatpush.msra.mxu2 %v860_v18 }
  0x7d   : > { %1055 = vmatpush.msra.mxu2 %v858_v21 }
  0x81   : > { %1936 = vmatmul.msk.f32.gmra.mxu2 %vm409_vm0, %v2354_v22 }
  0x82   : > { %1952 = vmatmul.msk.f32.gmra.mxu3 %vm409_vm0, %v2354_v22  ;;  %v890_v22 = vld [vmem:[#allocation6 + $0x360] sm:$0xff] }
  0x83   : > { %1120 = vmatpush.msra.mxu3 %v890_v22 }
  0x89   : > { %1937 = vmatmul.msk.f32.gmra.mxu2 %vm409_vm0, %v2368_v24 }
  0x8a   : > { %1953 = vmatmul.msk.f32.gmra.mxu3 %vm409_vm0, %v2368_v24  ;;  %v2454_v24 = vld [vmem:[%s3545_s2] sm:$0xf] }
  0x8b   : > { %v2461_v28 = vperm.slane %v2454_v24, 0  ;;  %v2464_v29 = vperm.slane %v2454_v24, 1 }
  0x91   : > { %1938 = vmatmul.msk.f32.gmra.mxu2 %vm409_vm0, %v2382_v26 }
  0x92   : > { %1954 = vmatmul.msk.f32.gmra.mxu3 %vm409_vm0, %v2382_v26  ;;  %v856_v26 = vld [vmem:[#allocation6 + $0x250] sm:$0xff] }
  0x93   : > { %1056 = vmatpush.msra.mxu2 %v856_v26  ;;  %v877_v26 = vld [vmem:[#allocation6 + $0x2f8] sm:$0xff] }
  0x95   : > { %1057 = vmatpush.msra.mxu2 %v854_v39 }
  0x97   : > { %1058 = vmatpush.msra.mxu2 %v852_v48  ;;  %v845_v48 = vld [vmem:[#allocation6 + $0x1f8] sm:$0xff] }
  0x98   : > { %1241 = vmatpush.msra.mxu1 %v845_v48 }
  0x99   : > { %1939 = vmatmul.msk.f32.gmra.mxu2 %vm409_vm0, %v2396_v30 }
  0x9a   : > { %1955 = vmatmul.msk.f32.gmra.mxu3 %vm409_vm0, %v2396_v30  ;;  %v888_v30 = vld [vmem:[#allocation6 + $0x350] sm:$0xff]  ;;  %1059 = vmatpush.msra.mxu2 %v850_v57 }
  0x9b   : > { %1121 = vmatpush.msra.mxu3 %v888_v30 }
  0x9c   : > { %1060 = vmatpush.msra.mxu2 %v848_v2 }
  0x9d   : > { %1122 = vmatpush.msra.mxu3 %v886_v41 }
  0x9e   : > { %1061 = vmatpush.msra.mxu2 %v846_v7  ;;  %v843_v7 = vld [vmem:[#allocation6 + $0x1e8] sm:$0xff] }
  0x9f   : > { %1123 = vmatpush.msra.mxu3 %v884_v50  ;;  %1242 = vmatpush.msra.mxu1 %v843_v7 }
  0xa0   : > { %1306 = vmatpush.msrb.mxu2 %v877_v26  ;;  %v809_v26 = vld [vmem:[#allocation6 + $0xd8] sm:$0xff] }
  0xa1   : > { %1940 = vmatmul.msk.f32.gmra.mxu2 %vm409_vm0, %v2410_v34  ;;  %1124 = vmatpush.msra.mxu3 %v882_v59  ;;  %v811_v59 = vld [vmem:[#allocation6 + $0xe8] sm:$0xff] }
  0xa2   : > { %1956 = vmatmul.msk.f32.gmra.mxu3 %vm409_vm0, %v2410_v34 }
  0xa3   : > { %1125 = vmatpush.msra.mxu3 %v880_v4 }
  0xa5   : > { %1126 = vmatpush.msra.mxu3 %v878_v14 }
  0xa6   : > { %v475_v32 = vpop.f32.mrf.mxu0 }
  0xa7   : > { %v2467_v33 = vadd.f32 %v475_v32, %v2461_v28  ;;  %v540_v36 = vpop.f32.mrf.mxu1  ;;  %v813_v32 = vld [vmem:[#allocation6 + $0xf8] sm:$0xff] }
  0xa8   : > { %v2470_v37 = vadd.f32 %v540_v36, %v2464_v29  ;;  %v909_v36 = vld [vmem:[#allocation6 + $0x3f8] sm:$0xff]  ;;  %1176 = vmatpush.msra.mxu0 %v813_v32 }
  0xa9   : > { %v718_v34 = vmax.f32 %v2467_v33, 0.0  ;;  %1941 = vmatmul.msk.f32.gmra.mxu2 %vm409_vm0, %v2315_v9  ;;  %1371 = vmatpush.msrb.mxu3 %v909_v36  ;;  %v905_v32 = vld [vmem:[#allocation6 + $0x3d8] sm:$0xff] }
  0xaa   : > { %v719_v38 = vmax.f32 %v2470_v37, 0.0  ;;  %1957 = vmatmul.msk.f32.gmra.mxu3 %vm409_vm0, %v2315_v9  ;;  %1177 = vmatpush.msra.mxu0 %v811_v59 }
  0xab   : > { %932 = vmatmul.f32.vlgmr.msrb.gmra.mxu0 %v718_v34 }
  0xac   : > { %997 = vmatmul.f32.vlgmr.msrb.gmra.mxu1 %v719_v38  ;;  %v2482_v40 = vpop.f32.mrf.mxu2  ;;  %1178 = vmatpush.msra.mxu0 %v809_v26 }
  0xad   : > { %v2484_v42 = vpop.f32.mrf.mxu3  ;;  %v2626_v36 = vadd.f32 %v2482_v40, %v2461_v28  ;;  %v2640_v40 = vperm.slane %v2454_v24, 3 }
  0xae   : > { %v478_v43 = vpop.f32.mrf.mxu0 }
  0xaf   : > { %v2487_v44 = vadd.f32 %v478_v43, %v2461_v28  ;;  %v543_v45 = vpop.f32.mrf.mxu1  ;;  %v3556_v48 = vmax.f32 %v2626_v36, 0.0 }
  0xb0   : > { %v2490_v9 = vadd.f32 %v543_v45, %v2464_v29 }
  0xb1   : > { %1942 = vmatmul.msk.f32.gmra.mxu2 %vm409_vm0, %v2329_v17  ;;  %v722_v46 = vmax.f32 %v2487_v44, 0.0 }
  0xb2   : > { %1958 = vmatmul.msk.f32.gmra.mxu3 %vm409_vm0, %v2329_v17  ;;  %v723_v47 = vmax.f32 %v2490_v9, 0.0  ;;  %v851_v9 = vld [vmem:[#allocation6 + $0x228] sm:$0xff] }
  0xb3   : > { %935 = vmatmul.f32.gmra.mxu0 %v722_v46 }
  0xb4   : > { %1000 = vmatmul.f32.gmra.mxu1 %v723_v47  ;;  %v2502_v49 = vpop.f32.mrf.mxu2 }
  0xb5   : > { %v2504_v51 = vpop.f32.mrf.mxu3  ;;  %v2648_v7 = vadd.f32 %v2502_v49, %v2461_v28 }
  0xb6   : > { %v481_v52 = vpop.f32.mrf.mxu0  ;;  %v2655_v26 = vadd.f32 %v2504_v51, %v2464_v29 }
  0xb7   : > { %v2507_v53 = vadd.f32 %v481_v52, %v2461_v28  ;;  %v546_v17 = vpop.f32.mrf.mxu1  ;;  %v3558_v49 = vmax.f32 %v2648_v7, 0.0 }
  0xb8   : > { %v2510_v54 = vadd.f32 %v546_v17, %v2464_v29  ;;  %v875_v17 = vld [vmem:[#allocation6 + $0x2e8] sm:$0xff]  ;;  %v3557_v51 = vmax.f32 %v2655_v26, 0.0 }
  0xb9   : > { %1943 = vmatmul.msk.f32.gmra.mxu2 %vm409_vm0, %v2343_v19  ;;  %v726_v55 = vmax.f32 %v2507_v53, 0.0 }
  0xba   : > { %1959 = vmatmul.msk.f32.gmra.mxu3 %vm409_vm0, %v2343_v19  ;;  %v727_v56 = vmax.f32 %v2510_v54, 0.0  ;;  %1307 = vmatpush.msrb.mxu2 %v875_v17  ;;  %v2636_v17 = vperm.slane %v2454_v24, 2 }
  0xbb   : > { %938 = vmatmul.f32.gmra.mxu0 %v726_v55 }
  0xbc   : > { %1003 = vmatmul.f32.gmra.mxu1 %v727_v56  ;;  %v2522_v58 = vpop.f32.mrf.mxu2 }
  0xbd   : > { %v2524_v60 = vpop.f32.mrf.mxu3 }
  0xbe   : > { %v484_v61 = vpop.f32.mrf.mxu0 }
  0xbf   : > { %v2527_v62 = vadd.f32 %v484_v61, %v2461_v28  ;;  %v549_v19 = vpop.f32.mrf.mxu1  ;;  %v907_v61 = vld [vmem:[#allocation6 + $0x3e8] sm:$0xff] }
  0xc0   : > { %v2530_v63 = vadd.f32 %v549_v19, %v2464_v29  ;;  %1372 = vmatpush.msrb.mxu3 %v907_v61  ;;  %v871_v61 = vld [vmem:[#allocation6 + $0x2c8] sm:$0xff] }
  0xc1   : > { %1944 = vmatmul.msk.f32.gmra.mxu2 %vm409_vm0, %v2357_v23  ;;  %v3590_v0 = vmax.f32 %v2527_v62, 0.0  ;;  %v3624_v54 = vmax.f32 %v2527_v62, 0.0 }
  0xc2   : > { %1960 = vmatmul.msk.f32.gmra.mxu3 %vm409_vm0, %v2357_v23  ;;  %v3585_v1 = vmax.f32 %v2530_v63, 0.0 }
  0xc3   : > { %941 = vmatmul.f32.gmra.mxu0 %v3590_v0  ;;  %1373 = vmatpush.msrb.mxu3 %v905_v32 }
  0xc4   : > { %1006 = vmatmul.f32.gmra.mxu1 %v3585_v1  ;;  %v2542_v3 = vpop.f32.mrf.mxu2 }
  0xc5   : > { %v2544_v5 = vpop.f32.mrf.mxu3 }
  0xc6   : > { %v487_v6 = vpop.f32.mrf.mxu0 }
  0xc7   : > { %v2547_v23 = vadd.f32 %v487_v6, %v2461_v28  ;;  %v552_v8 = vpop.f32.mrf.mxu1 }
  0xc8   : > { %v2550_v10 = vadd.f32 %v552_v8, %v2464_v29 }
  0xc9   : > { %1945 = vmatmul.msk.f32.gmra.mxu2 %vm409_vm0, %v2371_v25  ;;  %v3575_v11 = vmax.f32 %v2547_v23, 0.0 }
  0xca   : > { %1961 = vmatmul.msk.f32.gmra.mxu3 %vm409_vm0, %v2371_v25  ;;  %v3571_v12 = vmax.f32 %v2550_v10, 0.0 }
  0xcb   : > { %944 = vmatmul.f32.gmra.mxu0 %v3575_v11 }
  0xcc   : > { %1009 = vmatmul.f32.gmra.mxu1 %v3571_v12  ;;  %v2562_v13 = vpop.f32.mrf.mxu2 }
  0xcd   : > { %v2564_v15 = vpop.f32.mrf.mxu3 }
  0xce   : > { %v490_v16 = vpop.f32.mrf.mxu0 }
  0xcf   : > { %v2567_v18 = vadd.f32 %v490_v16, %v2461_v28  ;;  %v555_v20 = vpop.f32.mrf.mxu1  ;;  %v873_v16 = vld [vmem:[#allocation6 + $0x2d8] sm:$0xff] }
  0xd0   : > { %v2570_v25 = vadd.f32 %v555_v20, %v2464_v29  ;;  %1308 = vmatpush.msrb.mxu2 %v873_v16 }
  0xd1   : > { %1946 = vmatmul.msk.f32.gmra.mxu2 %vm409_vm0, %v2385_v27  ;;  %v3568_v21 = vmax.f32 %v2567_v18, 0.0 }
  0xd2   : > { %1962 = vmatmul.msk.f32.gmra.mxu3 %vm409_vm0, %v2385_v27  ;;  %v3567_v22 = vmax.f32 %v2570_v25, 0.0  ;;  %1309 = vmatpush.msrb.mxu2 %v871_v61 }
  0xd3   : > { %947 = vmatmul.f32.gmra.mxu0 %v3568_v21  ;;  %v825_v21 = vld [vmem:[#allocation6 + $0x158] sm:$0xff] }
  0xd4   : > { %1012 = vmatmul.f32.gmra.mxu1 %v3567_v22  ;;  %v2582_v30 = vpop.f32.mrf.mxu2 }
  0xd5   : > { %v2584_v39 = vpop.f32.mrf.mxu3  ;;  %v2752_v11 = vadd.f32 %v2582_v30, %v2461_v28 }
  0xd6   : > { %v493_v41 = vpop.f32.mrf.mxu0 }
  0xd7   : > { %v2587_v27 = vadd.f32 %v493_v41, %v2461_v28  ;;  %v558_v43 = vpop.f32.mrf.mxu1 }
  0xd8   : > { %v2590_v45 = vadd.f32 %v558_v43, %v2464_v29  ;;  %v841_v43 = vld [vmem:[#allocation6 + $0x1d8] sm:$0xff] }
  0xd9   : > { %1947 = vmatmul.msk.f32.gmra.mxu2 %vm409_vm0, %v2399_v31  ;;  %v3564_v50 = vmax.f32 %v2587_v27, 0.0  ;;  %1243 = vmatpush.msra.mxu1 %v841_v43 }
  0xda   : > { %1963 = vmatmul.msk.f32.gmra.mxu3 %vm409_vm0, %v2399_v31  ;;  %v3561_v52 = vmax.f32 %v2590_v45, 0.0 }
  0xdb   : > { %950 = vmatmul.f32.gmra.mxu0 %v3564_v50 }
  0xdc   : > { %1015 = vmatmul.f32.gmra.mxu1 %v3561_v52  ;;  %v2602_v57 = vpop.f32.mrf.mxu2  ;;  %v833_v52 = vld [vmem:[#allocation6 + $0x198] sm:$0xff] }
  0xdd   : > { %v2604_v19 = vpop.f32.mrf.mxu3 }
  0xde   : > { %v496_v2 = vpop.f32.mrf.mxu0 }
  0xdf   : > { %v2607_v31 = vadd.f32 %v496_v2, %v2461_v28  ;;  %v561_v4 = vpop.f32.mrf.mxu1  ;;  %v807_v2 = vld [vmem:[#allocation6 + $0xc8] sm:$0xff] }
  0xe0   : > { %v2610_v6 = vadd.f32 %v561_v4, %v2464_v29  ;;  %v903_v4 = vld [vmem:[#allocation6 + $0x3c8] sm:$0xff]  ;;  %1179 = vmatpush.msra.mxu0 %v807_v2 }
  0xe1   : > { %1948 = vmatmul.msk.f32.gmra.mxu2 %vm409_vm0, %v2413_v35  ;;  %v3560_v8 = vmax.f32 %v2607_v31, 0.0  ;;  %1374 = vmatpush.msrb.mxu3 %v903_v4  ;;  %v805_v4 = vld [vmem:[#allocation6 + $0xb8] sm:$0xff] }
  0xe2   : > { %1964 = vmatmul.msk.f32.gmra.mxu3 %vm409_vm0, %v2413_v35  ;;  %v3559_v14 = vmax.f32 %v2610_v6, 0.0  ;;  %v2632_v35 = vadd.f32 %v2484_v42, %v2464_v29  ;;  %1180 = vmatpush.msra.mxu0 %v805_v4  ;;  %v799_v4 = vld [vmem:[#allocation6 + $0x88] sm:$0xff] }
  0xe3   : > { %953 = vmatmul.f32.gmra.mxu0 %v3560_v8 }
  0xe4   : > { %1018 = vmatmul.f32.gmra.mxu1 %v3559_v14  ;;  %v2622_v20 = vpop.f32.mrf.mxu2  ;;  %v3553_v59 = vmax.f32 %v2632_v35, 0.0  ;;  %v835_v14 = vld [vmem:[#allocation6 + $0x1a8] sm:$0xff] }
  0xe5   : > { %v2628_v41 = vpop.f32.mrf.mxu3 }
  0xe6   : > { %v2811_v1 = vadd.f32 %v2628_v41, %v2464_v29 }
  0xeb   : > { %956 = vmatmul.f32.gmra.mxu0 %v3556_v48 }
  0xec   : > { %1021 = vmatmul.f32.gmra.mxu1 %v3553_v59  ;;  %v605_v42 = vpop.f32.mrf.mxu2  ;;  %v839_v59 = vld [vmem:[#allocation6 + $0x1c8] sm:$0xff] }
  0xed   : > { %v2651_v16 = vadd.f32 %v605_v42, %v2636_v17  ;;  %v670_v24 = vpop.f32.mrf.mxu3  ;;  %1244 = vmatpush.msra.mxu1 %v839_v59  ;;  %v869_v42 = vld [vmem:[#allocation6 + $0x2b8] sm:$0xff]  ;;  %v2674_v59 = vadd.f32 %v2522_v58, %v2461_v28 }
  0xee   : > { %v2658_v32 = vadd.f32 %v670_v24, %v2640_v40  ;;  %1310 = vmatpush.msrb.mxu2 %v869_v42  ;;  %v901_v24 = vld [vmem:[#allocation6 + $0x3b8] sm:$0xff]  ;;  %v2681_v42 = vadd.f32 %v2524_v60, %v2464_v29 }
  0xef   : > { %v3554_v43 = vmax.f32 %v2651_v16, 0.0  ;;  %1375 = vmatpush.msrb.mxu3 %v901_v24  ;;  %v3566_v60 = vmax.f32 %v2674_v59, 0.0  ;;  %v899_v24 = vld [vmem:[#allocation6 + $0x3a8] sm:$0xff] }
  0xf0   : > { %v3555_v61 = vmax.f32 %v2658_v32, 0.0 }
  0xf1   : > { %1062 = vmatmul.f32.vlgmr.msra.gmra.mxu2 %v3554_v43  ;;  %v837_v43 = vld [vmem:[#allocation6 + $0x1b8] sm:$0xff]  ;;  %1376 = vmatpush.msrb.mxu3 %v899_v24  ;;  %v791_v24 = vld [vmem:[#allocation6 + $0x48] sm:$0xff] }
  0xf2   : > { %1127 = vmatmul.f32.vlgmr.msra.gmra.mxu3 %v3555_v61  ;;  %1245 = vmatpush.msra.mxu1 %v837_v43  ;;  %v867_v43 = vld [vmem:[#allocation6 + $0x2a8] sm:$0xff] }
  0xf3   : > { %959 = vmatmul.f32.gmra.mxu0 %v3558_v49  ;;  %v803_v49 = vld [vmem:[#allocation6 + $0xa8] sm:$0xff]  ;;  %1311 = vmatpush.msrb.mxu2 %v867_v43  ;;  %v2707_v43 = vadd.f32 %v2544_v5, %v2464_v29 }
  0xf4   : > { %1024 = vmatmul.f32.gmra.mxu1 %v3557_v51  ;;  %v608_v2 = vpop.f32.mrf.mxu2  ;;  %1181 = vmatpush.msra.mxu0 %v803_v49  ;;  %v831_v49 = vld [vmem:[#allocation6 + $0x188] sm:$0xff] }
  0xf5   : > { %v2677_v61 = vadd.f32 %v608_v2, %v2636_v17  ;;  %v673_v48 = vpop.f32.mrf.mxu3  ;;  %1246 = vmatpush.msra.mxu1 %v835_v14  ;;  %v801_v2 = vld [vmem:[#allocation6 + $0x98] sm:$0xff] }
  0xf6   : > { %v2684_v51 = vadd.f32 %v673_v48, %v2640_v40  ;;  %1182 = vmatpush.msra.mxu0 %v801_v2  ;;  %v3565_v48 = vmax.f32 %v2681_v42, 0.0  ;;  %v797_v2 = vld [vmem:[#allocation6 + $0x78] sm:$0xff] }
  0xf7   : > { %v3562_v8 = vmax.f32 %v2677_v61, 0.0  ;;  %1247 = vmatpush.msra.mxu1 %v833_v52 }
  0xf8   : > { %v3563_v58 = vmax.f32 %v2684_v51, 0.0  ;;  %1183 = vmatpush.msra.mxu0 %v799_v4  ;;  %v795_v4 = vld [vmem:[#allocation6 + $0x68] sm:$0xff] }
  0xf9   : > { %1065 = vmatmul.f32.gmra.mxu2 %v3562_v8  ;;  %v829_v8 = vld [vmem:[#allocation6 + $0x178] sm:$0xff]  ;;  %1248 = vmatpush.msra.mxu1 %v831_v49 }
  0xfa   : > { %1130 = vmatmul.f32.gmra.mxu3 %v3563_v58  ;;  %v2700_v58 = vadd.f32 %v2542_v3, %v2461_v28  ;;  %1184 = vmatpush.msra.mxu0 %v797_v2  ;;  %v865_v49 = vld [vmem:[#allocation6 + $0x298] sm:$0xff] }
  0xfb   : > { %962 = vmatmul.f32.gmra.mxu0 %v3566_v60  ;;  %v827_v60 = vld [vmem:[#allocation6 + $0x168] sm:$0xff]  ;;  %1249 = vmatpush.msra.mxu1 %v829_v8 }
  0xfc   : > { %1027 = vmatmul.f32.gmra.mxu1 %v3565_v48  ;;  %v611_v14 = vpop.f32.mrf.mxu2  ;;  %1185 = vmatpush.msra.mxu0 %v795_v4  ;;  %v3573_v5 = vmax.f32 %v2700_v58, 0.0  ;;  %v823_v8 = vld [vmem:[#allocation6 + $0x148] sm:$0xff]  ;;  %v897_v4 = vld [vmem:[#allocation6 + $0x398] sm:$0xff] }
  0xfd   : > { %v2703_v52 = vadd.f32 %v611_v14, %v2636_v17  ;;  %v676_v50 = vpop.f32.mrf.mxu3  ;;  %v793_v14 = vld [vmem:[#allocation6 + $0x58] sm:$0xff]  ;;  %1250 = vmatpush.msra.mxu1 %v827_v60  ;;  %1312 = vmatpush.msrb.mxu2 %v865_v49  ;;  %v787_v49 = vld [vmem:[#allocation6 + $0x28] sm:$0xff] }
  0xfe   : > { %v2710_v48 = vadd.f32 %v676_v50, %v2640_v40  ;;  %v3572_v50 = vmax.f32 %v2707_v43, 0.0  ;;  %1186 = vmatpush.msra.mxu0 %v793_v14  ;;  %v789_v60 = vld [vmem:[#allocation6 + $0x38] sm:$0xff]  ;;  %1377 = vmatpush.msrb.mxu3 %v897_v4  ;;  %v783_v4 = vld [vmem:[#allocation6 + $0x8] sm:$0xff] }
  0xff   : > { %v3569_v22 = vmax.f32 %v2703_v52, 0.0  ;;  %1251 = vmatpush.msra.mxu1 %v825_v21  ;;  %v2733_v21 = vadd.f32 %v2564_v15, %v2464_v29  ;;  %v785_v15 = vld [vmem:[#allocation6 + $0x18] sm:$0xff] }
 0x100   : > { %v3570_v3 = vmax.f32 %v2710_v48, 0.0  ;;  %1187 = vmatpush.msra.mxu0 %v791_v24 }
 0x101   : > { %1068 = vmatmul.f32.gmra.mxu2 %v3569_v22  ;;  %v821_v22 = vld [vmem:[#allocation6 + $0x138] sm:$0xff]  ;;  %1252 = vmatpush.msra.mxu1 %v823_v8 }
 0x102   : > { %1133 = vmatmul.f32.gmra.mxu3 %v3570_v3  ;;  %v2726_v3 = vadd.f32 %v2562_v13, %v2461_v28  ;;  %1188 = vmatpush.msra.mxu0 %v789_v60  ;;  %v819_v13 = vld [vmem:[#allocation6 + $0x128] sm:$0xff]  ;;  %v817_v8 = vld [vmem:[#allocation6 + $0x118] sm:$0xff] }
 0x103   : > { %965 = vmatmul.f32.gmra.mxu0 %v3573_v5  ;;  %1253 = vmatpush.msra.mxu1 %v821_v22  ;;  %v863_v22 = vld [vmem:[#allocation6 + $0x288] sm:$0xff] }
 0x104   : > { %1030 = vmatmul.f32.gmra.mxu1 %v3572_v50  ;;  %v614_v2 = vpop.f32.mrf.mxu2  ;;  %v3577_v24 = vmax.f32 %v2726_v3, 0.0  ;;  %1189 = vmatpush.msra.mxu0 %v787_v49  ;;  %v895_v49 = vld [vmem:[#allocation6 + $0x388] sm:$0xff] }
 0x105   : > { %v2729_v14 = vadd.f32 %v614_v2, %v2636_v17  ;;  %v679_v12 = vpop.f32.mrf.mxu3  ;;  %1254 = vmatpush.msra.mxu1 %v819_v13  ;;  %1313 = vmatpush.msrb.mxu2 %v863_v22  ;;  %v861_v22 = vld [vmem:[#allocation6 + $0x278] sm:$0xff] }
 0x106   : > { %v2736_v50 = vadd.f32 %v679_v12, %v2640_v40  ;;  %v3578_v12 = vmax.f32 %v2733_v21, 0.0  ;;  %1190 = vmatpush.msra.mxu0 %v785_v15  ;;  %1378 = vmatpush.msrb.mxu3 %v895_v49 }
 0x107   : > { %v3574_v5 = vmax.f32 %v2729_v14, 0.0  ;;  %1255 = vmatpush.msra.mxu1 %v817_v8  ;;  %v3580_v8 = vmax.f32 %v2752_v11, 0.0  ;;  %1314 = vmatpush.msrb.mxu2 %v861_v22 }
 0x108   : > { %v3576_v2 = vmax.f32 %v2736_v50, 0.0  ;;  %1191 = vmatpush.msra.mxu0 %v783_v4  ;;  %v893_v4 = vld [vmem:[#allocation6 + $0x378] sm:$0xff] }
 0x109   : > { %1071 = vmatmul.f32.gmra.mxu2 %v3574_v5  ;;  %v815_v5 = vld [vmem:[#allocation6 + $0x108] sm:$0xff]  ;;  %1379 = vmatpush.msrb.mxu3 %v893_v4 }
 0x10a   : > { %1136 = vmatmul.f32.gmra.mxu3 %v3576_v2  ;;  %1256 = vmatpush.msra.mxu1 %v815_v5 }
 0x10b   : > { %968 = vmatmul.f32.gmra.mxu0 %v3577_v24  ;;  %v2759_v24 = vadd.f32 %v2584_v39, %v2464_v29 }
 0x10c   : > { %1033 = vmatmul.f32.gmra.mxu1 %v3578_v12  ;;  %v617_v60 = vpop.f32.mrf.mxu2 }
 0x10d   : > { %v2755_v2 = vadd.f32 %v617_v60, %v2636_v17  ;;  %v682_v13 = vpop.f32.mrf.mxu3  ;;  %v3581_v39 = vmax.f32 %v2759_v24, 0.0  ;;  %v2778_v60 = vadd.f32 %v2602_v57, %v2461_v28 }
 0x10e   : > { %v2762_v12 = vadd.f32 %v682_v13, %v2640_v40 }
 0x10f   : > { %v3583_v15 = vmax.f32 %v2755_v2, 0.0  ;;  %v3586_v57 = vmax.f32 %v2778_v60, 0.0 }
 0x110   : > { %v3579_v30 = vmax.f32 %v2762_v12, 0.0 }
 0x111   : > { %1074 = vmatmul.f32.gmra.mxu2 %v3583_v15 }
 0x112   : > { %1139 = vmatmul.f32.gmra.mxu3 %v3579_v30  ;;  %v2785_v30 = vadd.f32 %v2604_v19, %v2464_v29  ;;  %v859_v19 = vld [vmem:[#allocation6 + $0x268] sm:$0xff]  ;;  %v857_v29 = vld [vmem:[#allocation6 + $0x258] sm:$0xff] }
 0x113   : > { %971 = vmatmul.f32.gmra.mxu0 %v3580_v8  ;;  %1315 = vmatpush.msrb.mxu2 %v859_v19 }
 0x114   : > { %1036 = vmatmul.f32.gmra.mxu1 %v3581_v39  ;;  %v620_v5 = vpop.f32.mrf.mxu2 }
 0x115   : > { %v2781_v49 = vadd.f32 %v620_v5, %v2636_v17  ;;  %v685_v13 = vpop.f32.mrf.mxu3  ;;  %v3587_v5 = vmax.f32 %v2785_v30, 0.0  ;;  %1316 = vmatpush.msrb.mxu2 %v857_v29  ;;  %v855_v29 = vld [vmem:[#allocation6 + $0x248] sm:$0xff] }
 0x116   : > { %v2788_v8 = vadd.f32 %v685_v13, %v2640_v40  ;;  %v891_v13 = vld [vmem:[#allocation6 + $0x368] sm:$0xff] }
 0x117   : > { %v3582_v39 = vmax.f32 %v2781_v49, 0.0  ;;  %1380 = vmatpush.msrb.mxu3 %v891_v13  ;;  %1317 = vmatpush.msrb.mxu2 %v855_v29  ;;  %v885_v29 = vld [vmem:[#allocation6 + $0x338] sm:$0xff] }
 0x118   : > { %v3584_v22 = vmax.f32 %v2788_v8, 0.0 }
 0x119   : > { %1077 = vmatmul.f32.gmra.mxu2 %v3582_v39  ;;  %v2804_v39 = vadd.f32 %v2622_v20, %v2461_v28  ;;  %v3592_v20 = vmax.f32 %v2811_v1, 0.0 }
 0x11a   : > { %1142 = vmatmul.f32.gmra.mxu3 %v3584_v22 }
 0x11b   : > { %974 = vmatmul.f32.gmra.mxu0 %v3586_v57  ;;  %v3591_v28 = vmax.f32 %v2804_v39, 0.0 }
 0x11c   : > { %1039 = vmatmul.f32.gmra.mxu1 %v3587_v5  ;;  %v623_v4 = vpop.f32.mrf.mxu2 }
 0x11d   : > { %v2807_v15 = vadd.f32 %v623_v4, %v2636_v17  ;;  %v688_v22 = vpop.f32.mrf.mxu3 }
 0x11e   : > { %v2814_v57 = vadd.f32 %v688_v22, %v2640_v40  ;;  %v889_v22 = vld [vmem:[#allocation6 + $0x358] sm:$0xff] }
 0x11f   : > { %v3588_v5 = vmax.f32 %v2807_v15, 0.0  ;;  %1381 = vmatpush.msrb.mxu3 %v889_v22  ;;  %v887_v22 = vld [vmem:[#allocation6 + $0x348] sm:$0xff] }
 0x120   : > { %v3589_v19 = vmax.f32 %v2814_v57, 0.0 }
 0x121   : > { %1080 = vmatmul.f32.gmra.mxu2 %v3588_v5  ;;  %1382 = vmatpush.msrb.mxu3 %v887_v22 }
 0x122   : > { %1145 = vmatmul.f32.gmra.mxu3 %v3589_v19 }
 0x123   : > { %977 = vmatmul.f32.gmra.mxu0 %v3591_v28  ;;  %1383 = vmatpush.msrb.mxu3 %v885_v29 }
 0x124   : > { %1042 = vmatmul.f32.gmra.mxu1 %v3592_v20  ;;  %v626_v41 = vpop.f32.mrf.mxu2 }
 0x125   : > { %v2829_v4 = vadd.f32 %v626_v41, %v2636_v17  ;;  %v691_v13 = vpop.f32.mrf.mxu3 }
 0x126   : > { %v2832_v5 = vadd.f32 %v691_v13, %v2640_v40 }
 0x127   : > { %v3593_v19 = vmax.f32 %v2829_v4, 0.0 }
 0x128   : > { %v3594_v0 = vmax.f32 %v2832_v5, 0.0  ;;  %v2836_v28 = vpop.f32.mrf.mxu0 }
 0x129   : > { %1083 = vmatmul.f32.gmra.mxu2 %v3593_v19  ;;  %v2860_v37 = vpop.f32.mrf.mxu1 }
 0x12a   : > { %1148 = vmatmul.f32.gmra.mxu3 %v3594_v0 }
 0x12b   : > { %1192 = vmatmul.f32.vlgmr.msra.gmra.mxu0 %v718_v34 }
 0x12c   : > { %1257 = vmatmul.f32.vlgmr.msra.gmra.mxu1 %v719_v38  ;;  %v629_v41 = vpop.f32.mrf.mxu2  ;;  %v853_v38 = vld [vmem:[#allocation6 + $0x238] sm:$0xff] }
 0x12d   : > { %v2847_v13 = vadd.f32 %v629_v41, %v2636_v17  ;;  %v694_v20 = vpop.f32.mrf.mxu3  ;;  %1318 = vmatpush.msrb.mxu2 %v853_v38  ;;  %v883_v38 = vld [vmem:[#allocation6 + $0x328] sm:$0xff] }
 0x12e   : > { %v2850_v19 = vadd.f32 %v694_v20, %v2640_v40  ;;  %1384 = vmatpush.msrb.mxu3 %v883_v38  ;;  %v881_v38 = vld [vmem:[#allocation6 + $0x318] sm:$0xff] }
 0x12f   : > { %v3595_v0 = vmax.f32 %v2847_v13, 0.0  ;;  %1319 = vmatpush.msrb.mxu2 %v851_v9  ;;  %v3625_v9 = vmax.f32 %v2530_v63, 0.0  ;;  %v3627_v63 = vmax.f32 %v2547_v23, 0.0 }
 0x130   : > { %v3596_v33 = vmax.f32 %v2850_v19, 0.0  ;;  %v2854_v34 = vpop.f32.mrf.mxu0  ;;  %1385 = vmatpush.msrb.mxu3 %v881_v38 }
 0x131   : > { %1086 = vmatmul.f32.gmra.mxu2 %v3595_v0 }
 0x132   : > { %1151 = vmatmul.f32.gmra.mxu3 %v3596_v33 }
 0x133   : > { %1195 = vmatmul.f32.gmra.mxu0 %v722_v46 }
 0x134   : > { %1260 = vmatmul.f32.gmra.mxu1 %v723_v47  ;;  %v632_v20 = vpop.f32.mrf.mxu2 }
 0x135   : > { %v2867_v41 = vadd.f32 %v632_v20, %v2636_v17  ;;  %v697_v22 = vpop.f32.mrf.mxu3  ;;  %v2884_v20 = vpop.f32.mrf.mxu1 }
 0x136   : > { %v2870_v0 = vadd.f32 %v697_v22, %v2640_v40 }
 0x137   : > { %v3597_v33 = vmax.f32 %v2867_v41, 0.0 }
 0x138   : > { %3621 = vst [vmem:[#allocation12_spill] sm:$0xff] %v2870_v0  ;;  %v3598_v44 = vmax.f32 %v2870_v0, 0.0  ;;  %v2874_v46 = vpop.f32.mrf.mxu0 }
 0x139   : > { %1089 = vmatmul.f32.gmra.mxu2 %v3597_v33 }
 0x13a   : > { %1154 = vmatmul.f32.gmra.mxu3 %v3598_v44 }
 0x13b   : > { %1198 = vmatmul.f32.gmra.mxu0 %v726_v55 }
 0x13c   : > { %1263 = vmatmul.f32.gmra.mxu1 %v727_v56  ;;  %v635_v47 = vpop.f32.mrf.mxu2  ;;  %v849_v56 = vld [vmem:[#allocation6 + $0x218] sm:$0xff] }
 0x13d   : > { %v2887_v29 = vadd.f32 %v635_v47, %v2636_v17  ;;  %v700_v22 = vpop.f32.mrf.mxu3  ;;  %1320 = vmatpush.msrb.mxu2 %v849_v56  ;;  %v847_v56 = vld [vmem:[#allocation6 + $0x208] sm:$0xff] }
 0x13e   : > { %v2890_v33 = vadd.f32 %v700_v22, %v2640_v40 }
 0x13f   : > { %3622 = vst [vmem:[#allocation13_spill] sm:$0xff] %v2887_v29  ;;  %v3600_v53 = vmax.f32 %v2887_v29, 0.0  ;;  %1321 = vmatpush.msrb.mxu2 %v847_v56 }
 0x140   : > { %3623 = vst [vmem:[#allocation14_spill] sm:$0xff] %v2890_v33  ;;  %v3602_v55 = vmax.f32 %v2890_v33, 0.0  ;;  %v2894_v44 = vpop.f32.mrf.mxu0  ;;  %v2910_v33 = vpop.f32.mrf.mxu1 }
 0x141   : > { %1092 = vmatmul.f32.gmra.mxu2 %v3600_v53 }
 0x142   : > { %1157 = vmatmul.f32.gmra.mxu3 %v3602_v55 }
 0x143   : > { %1201 = vmatmul.f32.gmra.mxu0 %v3624_v54 }
 0x144   : > { %1266 = vmatmul.f32.gmra.mxu1 %v3625_v9  ;;  %v638_v47 = vpop.f32.mrf.mxu2 }
 0x145   : > { %v2905_v22 = vadd.f32 %v638_v47, %v2636_v17  ;;  %v703_v0 = vpop.f32.mrf.mxu3  ;;  %v879_v47 = vld [vmem:[#allocation6 + $0x308] sm:$0xff] }
 0x146   : > { %v2908_v53 = vadd.f32 %v703_v0, %v2640_v40  ;;  %v3628_v0 = vmax.f32 %v2550_v10, 0.0  ;;  %1386 = vmatpush.msrb.mxu3 %v879_v47  ;;  %v3631_v10 = vmax.f32 %v2567_v18, 0.0 }
 0x147   : > { %v3604_v62 = vmax.f32 %v2905_v22, 0.0 }
 0x148   : > { %3626 = vst [vmem:[#allocation15_spill] sm:$0xff] %v2908_v53  ;;  %v3605_v54 = vmax.f32 %v2908_v53, 0.0  ;;  %v2914_v55 = vpop.f32.mrf.mxu0  ;;  %v2934_v53 = vpop.f32.mrf.mxu1 }
 0x149   : > { %1095 = vmatmul.f32.gmra.mxu2 %v3604_v62 }
 0x14a   : > { %1160 = vmatmul.f32.gmra.mxu3 %v3605_v54 }
 0x14b   : > { %1204 = vmatmul.f32.gmra.mxu0 %v3627_v63 }
 0x14c   : > { %1269 = vmatmul.f32.gmra.mxu1 %v3628_v0  ;;  %v641_v9 = vpop.f32.mrf.mxu2 }
 0x14d   : > { %v2925_v38 = vadd.f32 %v641_v9, %v2636_v17  ;;  %v706_v29 = vpop.f32.mrf.mxu3 }
 0x14e   : > { %v2928_v62 = vadd.f32 %v706_v29, %v2640_v40  ;;  %v3632_v29 = vmax.f32 %v2570_v25, 0.0  ;;  %v3633_v25 = vmax.f32 %v2587_v27, 0.0 }
 0x14f   : > { %3629 = vst [vmem:[#allocation16_spill] sm:$0xff] %v2925_v38  ;;  %v3608_v54 = vmax.f32 %v2925_v38, 0.0 }
 0x150   : > { %3630 = vst [vmem:[#allocation17_spill] sm:$0xff] %v2928_v62  ;;  %v3612_v23 = vmax.f32 %v2928_v62, 0.0  ;;  %v2932_v63 = vpop.f32.mrf.mxu0  ;;  %v2958_v18 = vpop.f32.mrf.mxu1 }
 0x151   : > { %1098 = vmatmul.f32.gmra.mxu2 %v3608_v54 }
 0x152   : > { %1163 = vmatmul.f32.gmra.mxu3 %v3612_v23 }
 0x153   : > { %1207 = vmatmul.f32.gmra.mxu0 %v3631_v10  ;;  %v1483_v10 = vld [vmem:[%s3548_s5 + $0x78] sm:$0xff] }
 0x154   : > { %1272 = vmatmul.f32.gmra.mxu1 %v3632_v29  ;;  %v644_v56 = vpop.f32.mrf.mxu2  ;;  %v3634_v29 = vmax.f32 %v2590_v45, 0.0  ;;  %1504 = vmatpush.msrb.mxu0 %v1483_v10  ;;  %v3636_v10 = vmax.f32 %v2607_v31, 0.0 }
 0x155   : > { %v2945_v0 = vadd.f32 %v644_v56, %v2636_v17  ;;  %v709_v9 = vpop.f32.mrf.mxu3 }
 0x156   : > { %v2948_v47 = vadd.f32 %v709_v9, %v2640_v40  ;;  %v1499_v9 = vld [vmem:[%s3548_s5 + $0xf8] sm:$0xff] }
 0x157   : > { %v3611_v38 = vmax.f32 %v2945_v0, 0.0  ;;  %1569 = vmatpush.msrb.mxu1 %v1499_v9  ;;  %v1498_v9 = vld [vmem:[%s3548_s5 + $0xf0] sm:$0xff] }
 0x158   : > { %v3610_v54 = vmax.f32 %v2948_v47, 0.0  ;;  %v2952_v62 = vpop.f32.mrf.mxu0 }
 0x159   : > { %1101 = vmatmul.f32.gmra.mxu2 %v3611_v38  ;;  %1570 = vmatpush.msrb.mxu1 %v1498_v9 }
 0x15a   : > { %1166 = vmatmul.f32.gmra.mxu3 %v3610_v54 }
 0x15b   : > { %1210 = vmatmul.f32.gmra.mxu0 %v3633_v25 }
 0x15c   : > { %1275 = vmatmul.f32.gmra.mxu1 %v3634_v29  ;;  %v647_v56 = vpop.f32.mrf.mxu2  ;;  %v3637_v29 = vmax.f32 %v2610_v6, 0.0 }
 0x15d   : > { %v2971_v54 = vadd.f32 %v647_v56, %v2636_v17  ;;  %v712_v38 = vpop.f32.mrf.mxu3 }
 0x15e   : > { %v2974_v27 = vadd.f32 %v712_v38, %v2640_v40  ;;  %v1482_v38 = vld [vmem:[%s3548_s5 + $0x70] sm:$0xff] }
 0x15f   : > { %v3613_v25 = vmax.f32 %v2971_v54, 0.0  ;;  %1505 = vmatpush.msrb.mxu0 %v1482_v38  ;;  %v3639_v38 = vmax.f32 %v2632_v35, 0.0  ;;  %v1480_v35 = vld [vmem:[%s3548_s5 + $0x60] sm:$0xff] }
 0x160   : > { %3635 = vst [vmem:[#allocation18_spill] sm:$0xff] %v2974_v27  ;;  %v3614_v23 = vmax.f32 %v2974_v27, 0.0  ;;  %v2978_v45 = vpop.f32.mrf.mxu0 }
 0x161   : > { %1104 = vmatmul.f32.gmra.mxu2 %v3613_v25  ;;  %v2994_v25 = vpop.f32.mrf.mxu1 }
 0x162   : > { %1169 = vmatmul.f32.gmra.mxu3 %v3614_v23 }
 0x163   : > { %1213 = vmatmul.f32.gmra.mxu0 %v3636_v10 }
 0x164   : > { %1278 = vmatmul.f32.gmra.mxu1 %v3637_v29  ;;  %v650_v56 = vpop.f32.mrf.mxu2 }
 0x165   : > { %v2997_v23 = vadd.f32 %v650_v56, %v2636_v17  ;;  %v715_v31 = vpop.f32.mrf.mxu3  ;;  %v3638_v17 = vmax.f32 %v2626_v36, 0.0  ;;  %v1497_v56 = vld [vmem:[%s3548_s5 + $0xe8] sm:$0xff]  ;;  %v3640_v36 = vmax.f32 %v2651_v16, 0.0  ;;  %v1496_v16 = vld [vmem:[%s3548_s5 + $0xe0] sm:$0xff] }
 0x166   : > { %v3000_v10 = vadd.f32 %v715_v31, %v2640_v40  ;;  %v1481_v40 = vld [vmem:[%s3548_s5 + $0x68] sm:$0xff]  ;;  %1571 = vmatpush.msrb.mxu1 %v1497_v56 }
 0x167   : > { %v3617_v27 = vmax.f32 %v2997_v23, 0.0  ;;  %1506 = vmatpush.msrb.mxu0 %v1481_v40  ;;  %v3642_v40 = vmax.f32 %v2648_v7, 0.0  ;;  %v1478_v7 = vld [vmem:[%s3548_s5 + $0x50] sm:$0xff] }
 0x168   : > { %v3616_v6 = vmax.f32 %v3000_v10, 0.0  ;;  %v3004_v29 = vpop.f32.mrf.mxu0  ;;  %1572 = vmatpush.msrb.mxu1 %v1496_v16  ;;  %v1476_v16 = vld [vmem:[%s3548_s5 + $0x40] sm:$0xff] }
 0x169   : > { %1107 = vmatmul.f32.gmra.mxu2 %v3617_v27  ;;  %v3020_v9 = vpop.f32.mrf.mxu1  ;;  %1507 = vmatpush.msrb.mxu0 %v1480_v35  ;;  %v3644_v35 = vmax.f32 %v2677_v61, 0.0  ;;  %v1495_v61 = vld [vmem:[%s3548_s5 + $0xd8] sm:$0xff] }
 0x16a   : > { %1172 = vmatmul.f32.gmra.mxu3 %v3616_v6  ;;  %1573 = vmatpush.msrb.mxu1 %v1495_v61 }
 0x16b   : > { %1216 = vmatmul.f32.gmra.mxu0 %v3638_v17  ;;  %v3641_v17 = vmax.f32 %v2658_v32, 0.0  ;;  %v1479_v32 = vld [vmem:[%s3548_s5 + $0x58] sm:$0xff] }
 0x16c   : > { %1281 = vmatmul.f32.gmra.mxu1 %v3639_v38  ;;  %v3643_v38 = vmax.f32 %v2655_v26, 0.0  ;;  %1508 = vmatpush.msrb.mxu0 %v1479_v32  ;;  %v1477_v26 = vld [vmem:[%s3548_s5 + $0x48] sm:$0xff]  ;;  %v3646_v32 = vmax.f32 %v2674_v59, 0.0  ;;  %v1474_v59 = vld [vmem:[%s3548_s5 + $0x30] sm:$0xff] }
 0x16e   : > { %1509 = vmatpush.msrb.mxu0 %v1478_v7  ;;  %v3647_v7 = vmax.f32 %v2681_v42, 0.0  ;;  %v1473_v42 = vld [vmem:[%s3548_s5 + $0x28] sm:$0xff] }
 0x170   : > { %v3022_v31 = vpop.f32.mrf.mxu0  ;;  %1510 = vmatpush.msrb.mxu0 %v1477_v26 }
 0x171   : > { %1322 = vmatmul.f32.vlgmr.msrb.gmra.mxu2 %v3640_v36 }
 0x172   : > { %1387 = vmatmul.f32.vlgmr.msrb.gmra.mxu3 %v3641_v17  ;;  %v3051_v17 = vpop.f32.mrf.mxu1  ;;  %1511 = vmatpush.msrb.mxu0 %v1476_v16  ;;  %v1472_v16 = vld [vmem:[%s3548_s5 + $0x20] sm:$0xff] }
 0x173   : > { %1219 = vmatmul.f32.gmra.mxu0 %v3642_v40 }
 0x174   : > { %1284 = vmatmul.f32.gmra.mxu1 %v3643_v38  ;;  %v3035_v56 = vpop.f32.mrf.mxu2  ;;  %v3645_v38 = vmax.f32 %v2684_v51, 0.0  ;;  %v1475_v51 = vld [vmem:[%s3548_s5 + $0x38] sm:$0xff] }
 0x175   : > { %v3043_v36 = vpop.f32.mrf.mxu3  ;;  %1512 = vmatpush.msrb.mxu0 %v1475_v51  ;;  %v3651_v51 = vmax.f32 %v2707_v43, 0.0  ;;  %v1469_v43 = vld [vmem:[%s3548_s5 + $0x8] sm:$0xff] }
 0x177   : > { %1513 = vmatpush.msrb.mxu0 %v1474_v59  ;;  %v1471_v59 = vld [vmem:[%s3548_s5 + $0x18] sm:$0xff] }
 0x178   : > { %v3055_v40 = vpop.f32.mrf.mxu0 }
 0x179   : > { %1325 = vmatmul.f32.gmra.mxu2 %v3644_v35  ;;  %v3648_v35 = vmax.f32 %v2703_v52, 0.0  ;;  %1514 = vmatpush.msrb.mxu0 %v1473_v42 }
 0x17a   : > { %1390 = vmatmul.f32.gmra.mxu3 %v3645_v38  ;;  %v3649_v38 = vmax.f32 %v2710_v48, 0.0  ;;  %v1494_v48 = vld [vmem:[%s3548_s5 + $0xd0] sm:$0xff] }
 0x17b   : > { %1222 = vmatmul.f32.gmra.mxu0 %v3646_v32  ;;  %v3089_v32 = vpop.f32.mrf.mxu1  ;;  %1574 = vmatpush.msrb.mxu1 %v1494_v48  ;;  %v3655_v48 = vmax.f32 %v2733_v21, 0.0  ;;  %v1492_v21 = vld [vmem:[%s3548_s5 + $0xc0] sm:$0xff] }
 0x17c   : > { %1287 = vmatmul.f32.gmra.mxu1 %v3647_v7  ;;  %v3066_v6 = vpop.f32.mrf.mxu2  ;;  %v3650_v7 = vmax.f32 %v2700_v58, 0.0  ;;  %1515 = vmatpush.msrb.mxu0 %v1472_v16  ;;  %v1470_v58 = vld [vmem:[%s3548_s5 + $0x10] sm:$0xff]  ;;  %v1468_v16 = vld [vmem:[%s3548_s5] sm:$0xff] }
 0x17d   : > { %v3074_v26 = vpop.f32.mrf.mxu3 }
 0x17e   : > { %1516 = vmatpush.msrb.mxu0 %v1471_v59 }
 0x180   : > { %v3093_v61 = vpop.f32.mrf.mxu0  ;;  %1517 = vmatpush.msrb.mxu0 %v1470_v58 }
 0x181   : > { %1328 = vmatmul.f32.gmra.mxu2 %v3648_v35  ;;  %v3652_v35 = vmax.f32 %v2729_v14, 0.0 }
 0x182   : > { %1393 = vmatmul.f32.gmra.mxu3 %v3649_v38  ;;  %v3653_v38 = vmax.f32 %v2736_v50, 0.0  ;;  %1518 = vmatpush.msrb.mxu0 %v1469_v43  ;;  %v3657_v43 = vmax.f32 %v2762_v12, 0.0 }
 0x183   : > { %1225 = vmatmul.f32.gmra.mxu0 %v3650_v7  ;;  %v3654_v7 = vmax.f32 %v2726_v3, 0.0  ;;  %v3129_v50 = vpop.f32.mrf.mxu1  ;;  %v3656_v3 = vmax.f32 %v2755_v2, 0.0 }
 0x184   : > { %1290 = vmatmul.f32.gmra.mxu1 %v3651_v51  ;;  %v3097_v52 = vpop.f32.mrf.mxu2  ;;  %v1493_v51 = vld [vmem:[%s3548_s5 + $0xc8] sm:$0xff]  ;;  %1519 = vmatpush.msrb.mxu0 %v1468_v16  ;;  %v3659_v16 = vmax.f32 %v2759_v24, 0.0  ;;  %v3661_v24 = vmax.f32 %v2788_v8, 0.0 }
 0x185   : > { %v3105_v42 = vpop.f32.mrf.mxu3  ;;  %1575 = vmatpush.msrb.mxu1 %v1493_v51 }
 0x187   : > { %1576 = vmatpush.msrb.mxu1 %v1492_v21  ;;  %v3663_v21 = vmax.f32 %v2785_v30, 0.0  ;;  %v3665_v30 = vmax.f32 %v2814_v57, 0.0 }
 0x188   : > { %v3133_v58 = vpop.f32.mrf.mxu0 }
 0x189   : > { %1331 = vmatmul.f32.gmra.mxu2 %v3652_v35  ;;  %v3658_v35 = vmax.f32 %v2752_v11, 0.0 }
 0x18a   : > { %1396 = vmatmul.f32.gmra.mxu3 %v3653_v38  ;;  %v3147_v38 = vld [vmem:[%s3547_s4] sm:$0x3] }
 0x18b   : > { %1228 = vmatmul.f32.gmra.mxu0 %v3654_v7  ;;  %v3156_v11 = vperm.slane %v3147_v38, 0  ;;  %v3158_v12 = vpop.f32.mrf.mxu1 }
 0x18c   : > { %1293 = vmatmul.f32.gmra.mxu1 %v3655_v48  ;;  %v3127_v14 = vpop.f32.mrf.mxu2 }
 0x18d   : > { %v3131_v59 = vpop.f32.mrf.mxu3  ;;  %v934_v48 = vadd.f32 %v2836_v28, %v3156_v11  ;;  %v937_v8 = vadd.f32 %v2854_v34, %v3156_v11  ;;  %v3667_v34 = vmax.f32 %v2811_v1, 0.0  ;;  %v3669_v1 = vmax.f32 %v2832_v5, 0.0 }
 0x18e   : > { %v943_v5 = vadd.f32 %v2894_v44, %v3156_v11 }
 0x18f   : > { %v999_v28 = vadd.f32 %v2860_v37, %v934_v48  ;;  %v3666_v37 = vmax.f32 %v2804_v39, 0.0  ;;  %v1490_v48 = vld [vmem:[%s3548_s5 + $0xb0] sm:$0xff]  ;;  %v940_v39 = vadd.f32 %v2874_v46, %v3156_v11 }
 0x190   : > { %v3160_v51 = vpop.f32.mrf.mxu0 }
 0x191   : > { %1334 = vmatmul.f32.gmra.mxu2 %v3656_v3  ;;  %v3660_v3 = vmax.f32 %v2781_v49, 0.0  ;;  %v1005_v46 = vadd.f32 %v2910_v33, %v940_v39  ;;  %v1488_v33 = vld [vmem:[%s3548_s5 + $0xa0] sm:$0xff] }
 0x192   : > { %1399 = vmatmul.f32.gmra.mxu3 %v3657_v43  ;;  %v3662_v43 = vmax.f32 %v2778_v60, 0.0  ;;  %v1064_v60 = vadd.f32 %v3035_v56, %v999_v28  ;;  %v3668_v28 = vmax.f32 %v2829_v4, 0.0 }
 0x193   : > { %1231 = vmatmul.f32.gmra.mxu0 %v3658_v35  ;;  %v1491_v35 = vld [vmem:[%s3548_s5 + $0xb8] sm:$0xff]  ;;  %v3183_v49 = vpop.f32.mrf.mxu1 }
 0x194   : > { %1296 = vmatmul.f32.gmra.mxu1 %v3659_v16  ;;  %v3151_v2 = vpop.f32.mrf.mxu2 }
 0x195   : > { %v3153_v7 = vpop.f32.mrf.mxu3  ;;  %1577 = vmatpush.msrb.mxu1 %v1491_v35 }
 0x197   : > { %1578 = vmatpush.msrb.mxu1 %v1490_v48  ;;  %v3671_v48 = vmax.f32 %v2850_v19, 0.0  ;;  %v946_v19 = vadd.f32 %v2914_v55, %v3156_v11 }
 0x199   : > { %1337 = vmatmul.f32.gmra.mxu2 %v3660_v3  ;;  %v3664_v3 = vmax.f32 %v2807_v15, 0.0  ;;  %v1002_v15 = vadd.f32 %v2884_v20, %v937_v8  ;;  %v1489_v20 = vld [vmem:[%s3548_s5 + $0xa8] sm:$0xff] }
 0x19a   : > { %1402 = vmatmul.f32.gmra.mxu3 %v3661_v24  ;;  %v3187_v24 = vpop.f32.mrf.mxu0  ;;  %1579 = vmatpush.msrb.mxu1 %v1489_v20 }
 0x19b   : > { %1234 = vmatmul.f32.gmra.mxu0 %v3662_v43  ;;  %v1129_v43 = vadd.f32 %v3043_v36, %v1064_v60 }
 0x19c   : > { %1299 = vmatmul.f32.gmra.mxu1 %v3663_v21  ;;  %v3175_v16 = vpop.f32.mrf.mxu2  ;;  %v1067_v21 = vadd.f32 %v3066_v6, %v1002_v15 }
 0x19d   : > { %v3178_v27 = vpop.f32.mrf.mxu3  ;;  %v1436_v57 = vmax.f32 %v1129_v43, 0.0  ;;  %1580 = vmatpush.msrb.mxu1 %v1488_v33 }
 0x19e   : > { %v1132_v4 = vadd.f32 %v3074_v26, %v1067_v21  ;;  %v3673_v21 = vld [vmem:[#allocation12_spill] sm:$0xff] }
 0x1a0   : > { %v1438_v60 = vmax.f32 %v1132_v4, 0.0 }
 0x1a1   : > { %1340 = vmatmul.f32.gmra.mxu2 %v3664_v3  ;;  %v3211_v3 = vpop.f32.mrf.mxu1 }
 0x1a2   : > { %1405 = vmatmul.f32.gmra.mxu3 %v3665_v30  ;;  %v3216_v36 = vpop.f32.mrf.mxu0  ;;  %v1070_v30 = vadd.f32 %v3097_v52, %v1005_v46  ;;  %v949_v46 = vadd.f32 %v2932_v63, %v3156_v11 }
 0x1a3   : > { %1237 = vmatmul.f32.gmra.mxu0 %v3666_v37  ;;  %v3670_v37 = vmax.f32 %v2847_v13, 0.0 }
 0x1a4   : > { %1302 = vmatmul.f32.gmra.mxu1 %v3667_v34  ;;  %v3198_v56 = vpop.f32.mrf.mxu2  ;;  %v1008_v34 = vadd.f32 %v2934_v53, %v943_v5  ;;  %v1135_v44 = vadd.f32 %v3105_v42, %v1070_v30  ;;  %v1487_v53 = vld [vmem:[%s3548_s5 + $0x98] sm:$0xff]  ;;  %v1014_v33 = vadd.f32 %v2994_v25, %v949_v46  ;;  %v1485_v25 = vld [vmem:[%s3548_s5 + $0x88] sm:$0xff] }
 0x1a5   : > { %v3202_v35 = vpop.f32.mrf.mxu3  ;;  %1581 = vmatpush.msrb.mxu1 %v1487_v53  ;;  %v3682_v46 = vld [vmem:[#allocation16_spill] sm:$0xff] }
 0x1a6   : > { %v1440_v43 = vmax.f32 %v1135_v44, 0.0  ;;  %v1073_v39 = vadd.f32 %v3127_v14, %v1008_v34 }
 0x1a8   : > { %v1138_v55 = vadd.f32 %v3131_v59, %v1073_v39  ;;  %v3679_v39 = vmax.f32 %v2905_v22, 0.0  ;;  %v955_v22 = vadd.f32 %v2978_v45, %v3156_v11 }
 0x1a9   : > { %1343 = vmatmul.f32.gmra.mxu2 %v3668_v28  ;;  %v3238_v15 = vpop.f32.mrf.mxu1  ;;  %v3674_v28 = vmax.f32 %v3673_v21, 0.0  ;;  %v3680_v21 = vld [vmem:[#allocation15_spill] sm:$0xff] }
 0x1aa   : > { %1408 = vmatmul.f32.gmra.mxu3 %v3669_v1  ;;  %v3242_v13 = vpop.f32.mrf.mxu0  ;;  %v1011_v1 = vadd.f32 %v2958_v18, %v946_v19  ;;  %v1442_v4 = vmax.f32 %v1138_v55, 0.0  ;;  %v1486_v18 = vld [vmem:[%s3548_s5 + $0x90] sm:$0xff]  ;;  %v1079_v19 = vadd.f32 %v3175_v16, %v1014_v33  ;;  %v1020_v45 = vadd.f32 %v3051_v17, %v955_v22 }
 0x1ab   : > { %1520 = vmatmul.f32.vlgmr.msrb.gmra.mxu0 %v1436_v57  ;;  %v3672_v57 = vmax.f32 %v2867_v41, 0.0  ;;  %1582 = vmatpush.msrb.mxu1 %v1486_v18 }
 0x1ac   : > { %v3218_v8 = vpop.f32.mrf.mxu2  ;;  %v1076_v5 = vadd.f32 %v3151_v2, %v1011_v1  ;;  %v952_v2 = vadd.f32 %v2952_v62, %v3156_v11  ;;  %v1144_v16 = vadd.f32 %v3178_v27, %v1079_v19  ;;  %v1484_v27 = vld [vmem:[%s3548_s5 + $0x80] sm:$0xff] }
 0x1ad   : > { %v3222_v6 = vpop.f32.mrf.mxu3  ;;  %1583 = vmatpush.msrb.mxu1 %v1485_v25  ;;  %v1085_v33 = vadd.f32 %v3218_v8, %v1020_v45  ;;  %v3689_v25 = vld [vmem:[#allocation18_spill] sm:$0xff] }
 0x1ae   : > { %v1141_v63 = vadd.f32 %v3153_v7, %v1076_v5  ;;  %v1017_v62 = vadd.f32 %v3020_v9, %v952_v2  ;;  %v1446_v1 = vmax.f32 %v1144_v16, 0.0  ;;  %v3684_v5 = vld [vmem:[#allocation17_spill] sm:$0xff]  ;;  %v3687_v2 = vmax.f32 %v2948_v47, 0.0 }
 0x1af   : > { %1584 = vmatpush.msrb.mxu1 %v1484_v27  ;;  %v1150_v17 = vadd.f32 %v3222_v6, %v1085_v33  ;;  %v3688_v47 = vmax.f32 %v2971_v54, 0.0 }
 0x1b0   : > { %v1444_v44 = vmax.f32 %v1141_v63, 0.0  ;;  %v1082_v55 = vadd.f32 %v3198_v56, %v1017_v62  ;;  %v3686_v63 = vmax.f32 %v2945_v0, 0.0  ;;  %v961_v62 = vadd.f32 %v3022_v31, %v3156_v11 }
 0x1b1   : > { %1346 = vmatmul.f32.gmra.mxu2 %v3670_v37  ;;  %v3260_v14 = vpop.f32.mrf.mxu1  ;;  %v3677_v37 = vld [vmem:[#allocation14_spill] sm:$0xff]  ;;  %v1450_v0 = vmax.f32 %v1150_v17, 0.0  ;;  %v3692_v31 = vmax.f32 %v3000_v10, 0.0 }
 0x1b2   : > { %1411 = vmatmul.f32.gmra.mxu3 %v3671_v48  ;;  %v3262_v41 = vpop.f32.mrf.mxu0  ;;  %v3678_v48 = vmax.f32 %v3677_v37, 0.0  ;;  %v1147_v56 = vadd.f32 %v3202_v35, %v1082_v55 }
 0x1b3   : > { %1523 = vmatmul.f32.gmra.mxu0 %v1438_v60  ;;  %v3675_v60 = vld [vmem:[#allocation13_spill] sm:$0xff] }
 0x1b4   : > { %v3234_v26 = vpop.f32.mrf.mxu2  ;;  %v3676_v30 = vmax.f32 %v3675_v60, 0.0  ;;  %v3685_v60 = vmax.f32 %v3684_v5, 0.0  ;;  %v1448_v18 = vmax.f32 %v1147_v56, 0.0 }
 0x1b5   : > { %v3240_v52 = vpop.f32.mrf.mxu3 }
 0x1b9   : > { %1349 = vmatmul.f32.gmra.mxu2 %v3672_v57 }
 0x1ba   : > { %1414 = vmatmul.f32.gmra.mxu3 %v3674_v28  ;;  %v3287_v57 = vpop.f32.mrf.mxu0  ;;  %v3681_v28 = vmax.f32 %v3680_v21, 0.0 }
 0x1bb   : > { %1526 = vmatmul.f32.gmra.mxu0 %v1440_v43  ;;  %v3283_v43 = vpop.f32.mrf.mxu1 }
 0x1bc   : > { %v3254_v42 = vpop.f32.mrf.mxu2 }
 0x1bd   : > { %v3258_v20 = vpop.f32.mrf.mxu3 }
 0x1c1   : > { %1352 = vmatmul.f32.gmra.mxu2 %v3676_v30 }
 0x1c2   : > { %1417 = vmatmul.f32.gmra.mxu3 %v3678_v48  ;;  %v3310_v9 = vpop.f32.mrf.mxu0 }
 0x1c3   : > { %1529 = vmatmul.f32.gmra.mxu0 %v1442_v4  ;;  %v3683_v4 = vmax.f32 %v3682_v46, 0.0  ;;  %v1258_v30 = vpop.f32.mrf.mxu1  ;;  %v3691_v46 = vmax.f32 %v2997_v23, 0.0 }
 0x1c4   : > { %v3274_v59 = vpop.f32.mrf.mxu2 }
 0x1c5   : > { %v3278_v34 = vpop.f32.mrf.mxu3 }
 0x1c9   : > { %1355 = vmatmul.f32.gmra.mxu2 %v3679_v39 }
 0x1ca   : > { %1420 = vmatmul.f32.gmra.mxu3 %v3681_v28  ;;  %v3330_v21 = vpop.f32.mrf.mxu0 }
 0x1cb   : > { %1532 = vmatmul.f32.gmra.mxu0 %v1444_v44  ;;  %v958_v44 = vadd.f32 %v3004_v29, %v3156_v11  ;;  %v1261_v35 = vpop.f32.mrf.mxu1  ;;  %v3690_v29 = vmax.f32 %v3689_v25, 0.0 }
 0x1cc   : > { %v3294_v7 = vpop.f32.mrf.mxu2 }
 0x1cd   : > { %v3298_v53 = vpop.f32.mrf.mxu3  ;;  %v1023_v8 = vadd.f32 %v3089_v32, %v958_v44  ;;  %v1026_v32 = vadd.f32 %v3129_v50, %v961_v62  ;;  %v973_v62 = vadd.f32 %v3160_v51, %v3156_v11 }
 0x1cf   : > { %v1088_v28 = vadd.f32 %v3234_v26, %v1023_v8  ;;  %v1091_v55 = vadd.f32 %v3254_v42, %v1026_v32 }
 0x1d1   : > { %1358 = vmatmul.f32.gmra.mxu2 %v3683_v4  ;;  %v1153_v16 = vadd.f32 %v3240_v52, %v1088_v28  ;;  %v964_v4 = vadd.f32 %v3055_v40, %v3156_v11  ;;  %v3356_v52 = vperm.slane %v3147_v38, 1  ;;  %v1156_v5 = vadd.f32 %v3258_v20, %v1091_v55 }
 0x1d2   : > { %1423 = vmatmul.f32.gmra.mxu3 %v3685_v60  ;;  %v3346_v26 = vpop.f32.mrf.mxu0  ;;  %v967_v38 = vadd.f32 %v3093_v61, %v3156_v11  ;;  %v970_v61 = vadd.f32 %v3133_v58, %v3156_v11 }
 0x1d3   : > { %1535 = vmatmul.f32.gmra.mxu0 %v1446_v1  ;;  %v1264_v1 = vpop.f32.mrf.mxu1  ;;  %v1452_v54 = vmax.f32 %v1153_v16, 0.0  ;;  %v1029_v42 = vadd.f32 %v3158_v12, %v964_v4  ;;  %v1194_v23 = vadd.f32 %v3242_v13, %v3356_v52  ;;  %v1454_v10 = vmax.f32 %v1156_v5, 0.0 }
 0x1d4   : > { %v3312_v37 = vpop.f32.mrf.mxu2  ;;  %v1032_v12 = vadd.f32 %v3183_v49, %v967_v38  ;;  %v1197_v13 = vadd.f32 %v3262_v41, %v3356_v52  ;;  %v1035_v41 = vadd.f32 %v3211_v3, %v970_v61  ;;  %v976_v5 = vadd.f32 %v3187_v24, %v3156_v11 }
 0x1d5   : > { %v3316_v48 = vpop.f32.mrf.mxu3  ;;  %v1094_v45 = vadd.f32 %v3274_v59, %v1029_v42  ;;  %v1259_v56 = vadd.f32 %v1258_v30, %v1194_v23 }
 0x1d6   : > { %v1097_v59 = vadd.f32 %v3294_v7, %v1032_v12  ;;  %v1262_v30 = vadd.f32 %v1261_v35, %v1197_v13  ;;  %v1200_v7 = vadd.f32 %v3287_v57, %v3356_v52  ;;  %v1100_v58 = vadd.f32 %v3312_v37, %v1035_v41 }
 0x1d7   : > { %v1159_v20 = vadd.f32 %v3278_v34, %v1094_v45  ;;  %v1038_v57 = vadd.f32 %v3238_v15, %v973_v62  ;;  %v1203_v37 = vadd.f32 %v3310_v9, %v3356_v52  ;;  %v1041_v15 = vadd.f32 %v3260_v14, %v976_v5 }
 0x1d8   : > { %v1162_v49 = vadd.f32 %v3298_v53, %v1097_v59  ;;  %v1265_v16 = vadd.f32 %v1264_v1, %v1200_v7  ;;  %v1206_v9 = vadd.f32 %v3330_v21, %v3356_v52  ;;  %v1209_v13 = vadd.f32 %v3346_v26, %v3356_v52 }
 0x1d9   : > { %1361 = vmatmul.f32.gmra.mxu2 %v3686_v63  ;;  %v1456_v44 = vmax.f32 %v1159_v20, 0.0 }
 0x1da   : > { %1426 = vmatmul.f32.gmra.mxu3 %v3687_v2  ;;  %v3367_v40 = vpop.f32.mrf.mxu0 }
 0x1db   : > { %1538 = vmatmul.f32.gmra.mxu0 %v1448_v18  ;;  %v1267_v27 = vpop.f32.mrf.mxu1 }
 0x1dc   : > { %v3325_v19 = vpop.f32.mrf.mxu2  ;;  %v1268_v42 = vadd.f32 %v1267_v27, %v1203_v37  ;;  %v979_v27 = vadd.f32 %v3216_v36, %v3156_v11 }
 0x1dd   : > { %v3328_v39 = vpop.f32.mrf.mxu3  ;;  %v1103_v51 = vadd.f32 %v3325_v19, %v1038_v57 }
 0x1de   : > { %v1044_v21 = vadd.f32 %v3283_v43, %v979_v27  ;;  %v1212_v43 = vadd.f32 %v3367_v40, %v3356_v52 }
 0x1df   : > { %v1168_v23 = vadd.f32 %v3328_v39, %v1103_v51 }
 0x1e1   : > { %1364 = vmatmul.f32.gmra.mxu2 %v3688_v47 }
 0x1e2   : > { %1429 = vmatmul.f32.gmra.mxu3 %v3690_v29  ;;  %v3378_v34 = vpop.f32.mrf.mxu0  ;;  %v1458_v29 = vmax.f32 %v1162_v49, 0.0 }
 0x1e3   : > { %1541 = vmatmul.f32.gmra.mxu0 %v1450_v0  ;;  %v1270_v8 = vpop.f32.mrf.mxu1 }
 0x1e4   : > { %v3340_v6 = vpop.f32.mrf.mxu2 }
 0x1e5   : > { %v3343_v22 = vpop.f32.mrf.mxu3  ;;  %v1106_v20 = vadd.f32 %v3340_v6, %v1041_v15 }
 0x1e9   : > { %1367 = vmatmul.f32.gmra.mxu2 %v3691_v46 }
 0x1ea   : > { %1432 = vmatmul.f32.gmra.mxu3 %v3692_v31  ;;  %v3388_v46 = vpop.f32.mrf.mxu0 }
 0x1eb   : > { %1544 = vmatmul.f32.gmra.mxu0 %v1452_v54  ;;  %v1273_v53 = vpop.f32.mrf.mxu1  ;;  %v1165_v54 = vadd.f32 %v3316_v48, %v1100_v58 }
 0x1ec   : > { %v3358_v50 = vpop.f32.mrf.mxu2  ;;  %v1274_v36 = vadd.f32 %v1273_v53, %v1209_v13 }
 0x1ed   : > { %v3361_v60 = vpop.f32.mrf.mxu3  ;;  %v1460_v4 = vmax.f32 %v1165_v54, 0.0  ;;  %v1109_v59 = vadd.f32 %v3358_v50, %v1044_v21  ;;  %v1218_v54 = vadd.f32 %v3388_v46, %v3356_v52 }
 0x1f2   : > { %v1220_v19 = vpop.f32.mrf.mxu0 }
 0x1f3   : > { %1547 = vmatmul.f32.gmra.mxu0 %v1454_v10  ;;  %v1276_v38 = vpop.f32.mrf.mxu1 }
 0x1f4   : > { %v1323_v18 = vpop.f32.mrf.mxu2 }
 0x1f5   : > { %v1324_v33 = vadd.f32 %v1323_v18, %v1259_v56  ;;  %v1388_v63 = vpop.f32.mrf.mxu3  ;;  %v1462_v18 = vmax.f32 %v1168_v23, 0.0 }
 0x1f7   : > { %v1389_v2 = vadd.f32 %v1388_v63, %v1324_v33  ;;  %v1271_v33 = vadd.f32 %v1270_v8, %v1206_v9  ;;  %v1171_v63 = vadd.f32 %v3343_v22, %v1106_v20  ;;  %v1174_v22 = vadd.f32 %v3361_v60, %v1109_v59 }
 0x1f9   : > { %v1437_v17 = vmax.f32 %v1389_v2, 0.0  ;;  %v1464_v6 = vmax.f32 %v1171_v63, 0.0  ;;  %v1466_v26 = vmax.f32 %v1174_v22, 0.0 }
 0x1fa   : > { %v1223_v11 = vpop.f32.mrf.mxu0 }
 0x1fb   : > { %1550 = vmatmul.f32.gmra.mxu0 %v1456_v44  ;;  %1585 = vmatmul.f32.vlgmr.msrb.gmra.mxu1 %v1437_v17  ;;  %v1279_v44 = vpop.f32.mrf.mxu1  ;;  %v1224_v46 = vadd.f32 %v1223_v11, %v3356_v52 }
 0x1fc   : > { %v1326_v0 = vpop.f32.mrf.mxu2 }
 0x1fd   : > { %v1327_v28 = vadd.f32 %v1326_v0, %v1262_v30  ;;  %v1391_v47 = vpop.f32.mrf.mxu3 }
 0x1ff   : > { %v1392_v25 = vadd.f32 %v1391_v47, %v1327_v28  ;;  %v1277_v28 = vadd.f32 %v1276_v38, %v1212_v43 }
 0x201   : > { %v1439_v35 = vmax.f32 %v1392_v25, 0.0 }
 0x202   : > { %v1226_v50 = vpop.f32.mrf.mxu0 }
 0x203   : > { %1553 = vmatmul.f32.gmra.mxu0 %v1458_v29  ;;  %1588 = vmatmul.f32.gmra.mxu1 %v1439_v35  ;;  %v1282_v47 = vpop.f32.mrf.mxu1  ;;  %v1215_v29 = vadd.f32 %v3378_v34, %v3356_v52  ;;  %v1221_v34 = vadd.f32 %v1220_v19, %v3356_v52  ;;  %v1227_v27 = vadd.f32 %v1226_v50, %v3356_v52 }
 0x204   : > { %v1329_v32 = vpop.f32.mrf.mxu2  ;;  %v1283_v57 = vadd.f32 %v1282_v47, %v1218_v54 }
 0x205   : > { %v1330_v55 = vadd.f32 %v1329_v32, %v1265_v16  ;;  %v1394_v3 = vpop.f32.mrf.mxu3  ;;  %v1280_v35 = vadd.f32 %v1279_v44, %v1215_v29 }
 0x207   : > { %v1395_v31 = vadd.f32 %v1394_v3, %v1330_v55 }
 0x209   : > { %v1441_v1 = vmax.f32 %v1395_v31, 0.0 }
 0x20a   : > { %v1229_v53 = vpop.f32.mrf.mxu0 }
 0x20b   : > { %1556 = vmatmul.f32.gmra.mxu0 %v1460_v4  ;;  %1591 = vmatmul.f32.gmra.mxu1 %v1441_v1  ;;  %v1285_v40 = vpop.f32.mrf.mxu1  ;;  %v1230_v44 = vadd.f32 %v1229_v53, %v3356_v52 }
 0x20c   : > { %v1332_v48 = vpop.f32.mrf.mxu2 }
 0x20d   : > { %v1333_v10 = vadd.f32 %v1332_v48, %v1268_v42  ;;  %v1397_v45 = vpop.f32.mrf.mxu3  ;;  %v1286_v48 = vadd.f32 %v1285_v40, %v1221_v34  ;;  %v3425_v34 = vld [vmem:[%s3549_s6] ss:$0 sm:$0xff] }
 0x20f   : > { %v1398_v56 = vadd.f32 %v1397_v45, %v1333_v10 }
 0x211   : > { %v1443_v24 = vmax.f32 %v1398_v56, 0.0 }
 0x212   : > { %v1232_v5 = vpop.f32.mrf.mxu0 }
 0x213   : > { %1559 = vmatmul.f32.gmra.mxu0 %v1462_v18  ;;  %1594 = vmatmul.f32.gmra.mxu1 %v1443_v24  ;;  %v1288_v51 = vpop.f32.mrf.mxu1 }
 0x214   : > { %v1335_v39 = vpop.f32.mrf.mxu2  ;;  %v1289_v18 = vadd.f32 %v1288_v51, %v1224_v46 }
 0x215   : > { %v1336_v14 = vadd.f32 %v1335_v39, %v1271_v33  ;;  %v1400_v12 = vpop.f32.mrf.mxu3 }
 0x217   : > { %v1401_v2 = vadd.f32 %v1400_v12, %v1336_v14 }
 0x219   : > { %v1445_v17 = vmax.f32 %v1401_v2, 0.0 }
 0x21a   : > { %v1235_v56 = vpop.f32.mrf.mxu0 }
 0x21b   : > { %1562 = vmatmul.f32.gmra.mxu0 %v1464_v6  ;;  %1597 = vmatmul.f32.gmra.mxu1 %v1445_v17  ;;  %v1291_v9 = vpop.f32.mrf.mxu1  ;;  %v1236_v50 = vadd.f32 %v1235_v56, %v3356_v52 }
 0x21c   : > { %v1338_v61 = vpop.f32.mrf.mxu2  ;;  %v1292_v63 = vadd.f32 %v1291_v9, %v1227_v27 }
 0x21d   : > { %v1339_v30 = vadd.f32 %v1338_v61, %v1274_v36  ;;  %v1403_v8 = vpop.f32.mrf.mxu3 }
 0x21f   : > { %v1404_v0 = vadd.f32 %v1403_v8, %v1339_v30  ;;  %v1233_v8 = vadd.f32 %v1232_v5, %v3356_v52 }
 0x221   : > { %v1447_v49 = vmax.f32 %v1404_v0, 0.0 }
 0x222   : > { %v1238_v12 = vpop.f32.mrf.mxu0 }
 0x223   : > { %1565 = vmatmul.f32.gmra.mxu0 %v1466_v26  ;;  %1600 = vmatmul.f32.gmra.mxu1 %v1447_v49  ;;  %v1294_v14 = vpop.f32.mrf.mxu1  ;;  %v1239_v40 = vadd.f32 %v1238_v12, %v3356_v52 }
 0x224   : > { %v1341_v41 = vpop.f32.mrf.mxu2  ;;  %v1295_v17 = vadd.f32 %v1294_v14, %v1230_v44 }
 0x225   : > { %v1342_v7 = vadd.f32 %v1341_v41, %v1277_v28  ;;  %v1406_v25 = vpop.f32.mrf.mxu3 }
 0x227   : > { %v1407_v60 = vadd.f32 %v1406_v25, %v1342_v7 }
 0x229   : > { %v1449_v58 = vmax.f32 %v1407_v60, 0.0 }
 0x22a   : > { %v1521_v30 = vpop.f32.mrf.mxu0 }
 0x22b   : > { %1603 = vmatmul.f32.gmra.mxu1 %v1449_v58  ;;  %v1297_v22 = vpop.f32.mrf.mxu1  ;;  %v1522_v52 = vadd.f32 %v3425_v34, %v1521_v30 }
 0x22c   : > { %v1344_v62 = vpop.f32.mrf.mxu2  ;;  %v1298_v26 = vadd.f32 %v1297_v22, %v1233_v8 }
 0x22d   : > { %v1345_v16 = vadd.f32 %v1344_v62, %v1280_v35  ;;  %v1409_v32 = vpop.f32.mrf.mxu3 }
 0x22f   : > { %v1410_v55 = vadd.f32 %v1409_v32, %v1345_v16 }
 0x231   : > { %v1451_v3 = vmax.f32 %v1410_v55, 0.0 }
 0x232   : > { %v1524_v25 = vpop.f32.mrf.mxu0 }
 0x233   : > { %1606 = vmatmul.f32.gmra.mxu1 %v1451_v3  ;;  %v1300_v7 = vpop.f32.mrf.mxu1 }
 0x234   : > { %v1347_v37 = vpop.f32.mrf.mxu2  ;;  %v1301_v60 = vadd.f32 %v1300_v7, %v1236_v50 }
 0x235   : > { %v1348_v31 = vadd.f32 %v1347_v37, %v1283_v57  ;;  %v1412_v4 = vpop.f32.mrf.mxu3 }
 0x237   : > { %v1413_v1 = vadd.f32 %v1412_v4, %v1348_v31 }
 0x239   : > { %v1453_v42 = vmax.f32 %v1413_v1, 0.0 }
 0x23a   : > { %v1527_v54 = vpop.f32.mrf.mxu0 }
 0x23b   : > { %1609 = vmatmul.f32.gmra.mxu1 %v1453_v42  ;;  %v1303_v53 = vpop.f32.mrf.mxu1  ;;  %v3431_v42 = vld [vmem:[%s3550_s7] ss:$0 sm:$0xff]  ;;  %v1528_v56 = vadd.f32 %v3425_v34, %v1527_v54 }
 0x23c   : > { %v1350_v23 = vpop.f32.mrf.mxu2  ;;  %v1304_v55 = vadd.f32 %v1303_v53, %v1239_v40 }
 0x23d   : > { %v1351_v10 = vadd.f32 %v1350_v23, %v1286_v48  ;;  %v1415_v45 = vpop.f32.mrf.mxu3 }
 0x23f   : > { %v1416_v15 = vadd.f32 %v1415_v45, %v1351_v10  ;;  %v1525_v45 = vadd.f32 %v3425_v34, %v1524_v25 }
 0x241   : > { %v1455_v38 = vmax.f32 %v1416_v15, 0.0 }
 0x242   : > { %v1530_v51 = vpop.f32.mrf.mxu0 }
 0x243   : > { %1612 = vmatmul.f32.gmra.mxu1 %v1455_v38 }
 0x244   : > { %v1353_v20 = vpop.f32.mrf.mxu2 }
 0x245   : > { %v1354_v24 = vadd.f32 %v1353_v20, %v1289_v18  ;;  %v1418_v19 = vpop.f32.mrf.mxu3 }
 0x247   : > { %v1419_v33 = vadd.f32 %v1418_v19, %v1354_v24 }
 0x249   : > { %v1457_v39 = vmax.f32 %v1419_v33, 0.0  ;;  %v1531_v33 = vadd.f32 %v3425_v34, %v1530_v51 }
 0x24a   : > { %v1533_v10 = vpop.f32.mrf.mxu0 }
 0x24b   : > { %1615 = vmatmul.f32.gmra.mxu1 %v1457_v39 }
 0x24c   : > { %v1356_v21 = vpop.f32.mrf.mxu2 }
 0x24d   : > { %v1357_v13 = vadd.f32 %v1356_v21, %v1292_v63  ;;  %v1421_v2 = vpop.f32.mrf.mxu3 }
 0x24f   : > { %v1422_v6 = vadd.f32 %v1421_v2, %v1357_v13  ;;  %v1534_v13 = vadd.f32 %v3425_v34, %v1533_v10 }
 0x251   : > { %v1459_v59 = vmax.f32 %v1422_v6, 0.0 }
 0x252   : > { %v1536_v18 = vpop.f32.mrf.mxu0 }
 0x253   : > { %1618 = vmatmul.f32.gmra.mxu1 %v1459_v59 }
 0x254   : > { %v1359_v11 = vpop.f32.mrf.mxu2 }
 0x255   : > { %v1360_v36 = vadd.f32 %v1359_v11, %v1295_v17  ;;  %v1424_v61 = vpop.f32.mrf.mxu3  ;;  %v1537_v11 = vadd.f32 %v3425_v34, %v1536_v18 }
 0x257   : > { %v1425_v43 = vadd.f32 %v1424_v61, %v1360_v36 }
 0x259   : > { %v1461_v0 = vmax.f32 %v1425_v43, 0.0 }
 0x25a   : > { %v1539_v14 = vpop.f32.mrf.mxu0 }
 0x25b   : > { %1621 = vmatmul.f32.gmra.mxu1 %v1461_v0  ;;  %v1540_v43 = vadd.f32 %v3425_v34, %v1539_v14 }
 0x25c   : > { %v1362_v49 = vpop.f32.mrf.mxu2 }
 0x25d   : > { %v1363_v28 = vadd.f32 %v1362_v49, %v1298_v26  ;;  %v1427_v47 = vpop.f32.mrf.mxu3 }
 0x25f   : > { %v1428_v41 = vadd.f32 %v1427_v47, %v1363_v28 }
 0x261   : > { %v1463_v29 = vmax.f32 %v1428_v41, 0.0 }
 0x262   : > { %v1542_v59 = vpop.f32.mrf.mxu0 }
 0x263   : > { %1624 = vmatmul.f32.gmra.mxu1 %v1463_v29  ;;  %v1543_v47 = vadd.f32 %v3425_v34, %v1542_v59 }
 0x264   : > { %v1365_v58 = vpop.f32.mrf.mxu2 }
 0x265   : > { %v1366_v35 = vadd.f32 %v1365_v58, %v1301_v60  ;;  %v1430_v62 = vpop.f32.mrf.mxu3 }
 0x267   : > { %v1431_v16 = vadd.f32 %v1430_v62, %v1366_v35 }
 0x269   : > { %v1465_v32 = vmax.f32 %v1431_v16, 0.0 }
 0x26a   : > { %v1545_v8 = vpop.f32.mrf.mxu0 }
 0x26b   : > { %1627 = vmatmul.f32.gmra.mxu1 %v1465_v32  ;;  %v1546_v60 = vadd.f32 %v3425_v34, %v1545_v8 }
 0x26c   : > { %v1368_v3 = vpop.f32.mrf.mxu2 }
 0x26d   : > { %v1369_v57 = vadd.f32 %v1368_v3, %v1304_v55  ;;  %v1433_v37 = vpop.f32.mrf.mxu3 }
 0x26f   : > { %v1434_v31 = vadd.f32 %v1433_v37, %v1369_v57 }
 0x271   : > { %v1467_v4 = vmax.f32 %v1434_v31, 0.0 }
 0x272   : > { %v1548_v50 = vpop.f32.mrf.mxu0 }
 0x273   : > { %1630 = vmatmul.f32.gmra.mxu1 %v1467_v4  ;;  %v1549_v32 = vadd.f32 %v3425_v34, %v1548_v50 }
 0x278   : > { %v1586_v1 = vpop.f32.mrf.mxu1 }
 0x279   : > { %v1587_v5 = vadd.f32 %v1586_v1, %v1522_v52 }
 0x27a   : > { %v1551_v62 = vpop.f32.mrf.mxu0 }
 0x27b   : > { %v1634_v48 = vmax.f32 %v1587_v5, 0.0  ;;  %v1552_v37 = vadd.f32 %v3425_v34, %v1551_v62 }
 0x27d   : > { %v1654_v23 = vmul.f32 %v3431_v42, %v1634_v48 }
 0x27f   : > { %1670 = vadd.xlane.f32.xlu0 %v1654_v23 }
 0x280   : > { %v1589_v46 = vpop.f32.mrf.mxu1 }
 0x281   : > { %v1590_v15 = vadd.f32 %v1589_v46, %v1525_v45 }
 0x282   : > { %v1554_v3 = vpop.f32.mrf.mxu0 }
 0x283   : > { %v1635_v9 = vmax.f32 %v1590_v15, 0.0  ;;  %v1555_v5 = vadd.f32 %v3425_v34, %v1554_v3 }
 0x285   : > { %v1655_v38 = vmul.f32 %v3431_v42, %v1635_v9 }
 0x287   : > { %1672 = vadd.xlane.f32.xlu0 %v1655_v38 }
 0x288   : > { %v1592_v20 = vpop.f32.mrf.mxu1 }
 0x289   : > { %v1593_v24 = vadd.f32 %v1592_v20, %v1528_v56 }
 0x28a   : > { %v1557_v1 = vpop.f32.mrf.mxu0 }
 0x28b   : > { %v1636_v19 = vmax.f32 %v1593_v24, 0.0  ;;  %v1558_v46 = vadd.f32 %v3425_v34, %v1557_v1 }
 0x28d   : > { %v1656_v27 = vmul.f32 %v3431_v42, %v1636_v19 }
 0x28f   : > { %1674 = vadd.xlane.f32.xlu1 %v1656_v27 }
 0x290   : > { %v1595_v39 = vpop.f32.mrf.mxu1 }
 0x291   : > { %v1596_v63 = vadd.f32 %v1595_v39, %v1531_v33 }
 0x292   : > { %v1560_v15 = vpop.f32.mrf.mxu0 }
 0x293   : > { %v1637_v12 = vmax.f32 %v1596_v63, 0.0  ;;  %v1561_v20 = vadd.f32 %v3425_v34, %v1560_v15 }
 0x295   : > { %v1657_v21 = vmul.f32 %v3431_v42, %v1637_v12 }
 0x297   : > { %1676 = vadd.xlane.f32.xlu1 %v1657_v21 }
 0x298   : > { %v1598_v2 = vpop.f32.mrf.mxu1 }
 0x299   : > { %v1599_v44 = vadd.f32 %v1598_v2, %v1534_v13 }
 0x29a   : > { %v1563_v27 = vpop.f32.mrf.mxu0 }
 0x29b   : > { %v1638_v6 = vmax.f32 %v1599_v44, 0.0  ;;  %v1564_v63 = vadd.f32 %v3425_v34, %v1563_v27 }
 0x29d   : > { %v1658_v17 = vmul.f32 %v3431_v42, %v1638_v6 }
 0x29f   : > { %1678 = vadd.xlane.f32.xlu2 %v1658_v17 }
 0x2a0   : > { %v1601_v36 = vpop.f32.mrf.mxu1 }
 0x2a1   : > { %v1602_v61 = vadd.f32 %v1601_v36, %v1537_v11 }
 0x2a2   : > { %v1566_v13 = vpop.f32.mrf.mxu0 }
 0x2a3   : > { %v1639_v22 = vmax.f32 %v1602_v61, 0.0  ;;  %v1567_v44 = vadd.f32 %v3425_v34, %v1566_v13  ;;  %v3466_v34 = vstv %s1702_s24 }
 0x2a5   : > { %v1659_v30 = vmul.f32 %v3431_v42, %v1639_v22 }
 0x2a7   : > { %1680 = vadd.xlane.f32.xlu2 %v1659_v30 }
 0x2a8   : > { %v1604_v0 = vpop.f32.mrf.mxu1 }
 0x2a9   : > { %v1605_v26 = vadd.f32 %v1604_v0, %v1540_v43  ;;  %v1736_v0 = vlaneseq }
 0x2ab   : > { %v1640_v49 = vmax.f32 %v1605_v26, 0.0 }
 0x2ad   : > { %v1660_v28 = vmul.f32 %v3431_v42, %v1640_v49 }
 0x2af   : > { %1682 = vadd.xlane.f32.xlu0 %v1660_v28 }
 0x2b0   : > { %v1607_v41 = vpop.f32.mrf.mxu1 }
 0x2b1   : > { %v1608_v7 = vadd.f32 %v1607_v41, %v1543_v47  ;;  %v3464_v47 = vand.u32 127, %v1736_v0 }
 0x2b3   : > { %v1641_v25 = vmax.f32 %v1608_v7, 0.0  ;;  %v1739_v50 = vadd.s32 4294967288, %v3464_v47  ;;  %v1743_v7 = vadd.s32 4294967280, %v3464_v47  ;;  %v1755_v3 = vadd.s32 4294967256, %v3464_v47 }
 0x2b4   : > { %v1779_v27 = vadd.s32 4294967208, %v3464_v47  ;;  %v1795_v0 = vadd.s32 4294967176, %v3464_v47 }
 0x2b5   : > { %v1661_v29 = vmul.f32 %v3431_v42, %v1641_v25 }
 0x2b7   : > { %1684 = vadd.xlane.f32.xlu1 %v1661_v29  ;;  %v1747_v29 = vadd.s32 4294967272, %v3464_v47 }
 0x2b8   : > { %v1610_v58 = vpop.f32.mrf.mxu1 }
 0x2b9   : > { %v1611_v35 = vadd.f32 %v1610_v58, %v1546_v60 }
 0x2bb   : > { %v1642_v40 = vmax.f32 %v1611_v35, 0.0 }
 0x2bd   : > { %v1662_v16 = vmul.f32 %v3431_v42, %v1642_v40  ;;  %v1751_v40 = vadd.s32 4294967264, %v3464_v47 }
 0x2bf   : > { %1686 = vadd.xlane.f32.xlu2 %v1662_v16 }
 0x2c0   : > { %v1613_v53 = vpop.f32.mrf.mxu1 }
 0x2c1   : > { %v1614_v54 = vadd.f32 %v1613_v53, %v1549_v32 }
 0x2c3   : > { %v1643_v55 = vmax.f32 %v1614_v54, 0.0 }
 0x2c5   : > { %v1663_v57 = vmul.f32 %v3431_v42, %v1643_v55 }
 0x2c7   : > { %1688 = vadd.xlane.f32.xlu0 %v1663_v57 }
 0x2c8   : > { %v1616_v31 = vpop.f32.mrf.mxu1 }
 0x2c9   : > { %v1617_v4 = vadd.f32 %v1616_v31, %v1552_v37  ;;  %v1759_v31 = vadd.s32 4294967248, %v3464_v47 }
 0x2cb   : > { %v1644_v51 = vmax.f32 %v1617_v4, 0.0 }
 0x2cd   : > { %v1664_v52 = vmul.f32 %v3431_v42, %v1644_v51 }
 0x2cf   : > { %1690 = vadd.xlane.f32.xlu1 %v1664_v52  ;;  %v1763_v52 = vadd.s32 4294967240, %v3464_v47 }
 0x2d0   : > { %v1619_v48 = vpop.f32.mrf.mxu1 }
 0x2d1   : > { %v1620_v23 = vadd.f32 %v1619_v48, %v1555_v5  ;;  %v1767_v48 = vadd.s32 4294967232, %v3464_v47 }
 0x2d3   : > { %v1645_v10 = vmax.f32 %v1620_v23, 0.0 }
 0x2d5   : > { %v1665_v45 = vmul.f32 %v3431_v42, %v1645_v10 }
 0x2d7   : > { %1692 = vadd.xlane.f32.xlu2 %v1665_v45 }
 0x2d8   : > { %v1622_v9 = vpop.f32.mrf.mxu1 }
 0x2d9   : > { %v1623_v38 = vadd.f32 %v1622_v9, %v1558_v46  ;;  %v1771_v46 = vadd.s32 4294967224, %v3464_v47 }
 0x2db   : > { %v1646_v56 = vmax.f32 %v1623_v38, 0.0 }
 0x2dd   : > { %v1666_v18 = vmul.f32 %v3431_v42, %v1646_v56  ;;  %v1775_v56 = vadd.s32 4294967216, %v3464_v47 }
 0x2df   : > { %1694 = vadd.xlane.f32.xlu0 %v1666_v18 }
 0x2e0   : > { %v1625_v24 = vpop.f32.mrf.mxu1 }
 0x2e1   : > { %v1626_v19 = vadd.f32 %v1625_v24, %v1561_v20 }
 0x2e3   : > { %v1647_v33 = vmax.f32 %v1626_v19, 0.0 }
 0x2e5   : > { %v1667_v39 = vmul.f32 %v3431_v42, %v1647_v33 }
 0x2e7   : > { %1696 = vadd.xlane.f32.xlu1 %v1667_v39 }
 0x2e8   : > { %v1628_v14 = vpop.f32.mrf.mxu1 }
 0x2e9   : > { %v1629_v12 = vadd.f32 %v1628_v14, %v1564_v63  ;;  %v1783_v14 = vadd.s32 4294967200, %v3464_v47 }
 0x2eb   : > { %v1648_v21 = vmax.f32 %v1629_v12, 0.0 }
 0x2ed   : > { %v1668_v2 = vmul.f32 %v3431_v42, %v1648_v21 }
 0x2ef   : > { %1698 = vadd.xlane.f32.xlu2 %v1668_v2  ;;  %v1787_v2 = vadd.s32 4294967192, %v3464_v47 }
 0x2f0   : > { %v1631_v6 = vpop.f32.mrf.mxu1 }
 0x2f1   : > { %v1632_v59 = vadd.f32 %v1631_v6, %v1567_v44 }
 0x2f2   : > { %v1671_v36 = vpop.xlane.xlu0 %1670 }
 0x2f3   : > { %v1649_v17 = vmax.f32 %v1632_v59, 0.0  ;;  %v1704_v41 = vadd.f32 %v3466_v34, %v1671_v36 }
 0x2f5   : > { %v1669_v11 = vmul.f32 %v3431_v42, %v1649_v17  ;;  %v1738_v53 = vperm.slane %v1704_v41, %v3464_v47  ;;  %v1791_v17 = vadd.s32 4294967184, %v3464_v47 }
 0x2f7   : > { %1700 = vadd.xlane.f32.xlu0 %v1669_v11 }
 0x2fa   : > { %v1673_v30 = vpop.xlane.xlu0 %1672 }
 0x2fb   : > { %v1705_v42 = vadd.f32 %v3466_v34, %v1673_v30 }
 0x2fd   : > { %v1740_v35 = vperm.slane %v1705_v42, %v1739_v50 }
 0x2ff   : > { %v1742_v37 = vsel %vm1741_vm1, %v1740_v35, %v1738_v53 }
 0x302   : > { %v1675_v61 = vpop.xlane.xlu1 %1674 }
 0x303   : > { %v1706_v25 = vadd.f32 %v3466_v34, %v1675_v61 }
 0x305   : > { %v1744_v54 = vperm.slane %v1706_v25, %v1743_v7 }
 0x307   : > { %v1746_v5 = vsel %vm1745_vm2, %v1744_v54, %v1742_v37 }
 0x30a   : > { %v1677_v8 = vpop.xlane.xlu1 %1676 }
 0x30b   : > { %v1707_v60 = vadd.f32 %v3466_v34, %v1677_v8 }
 0x30d   : > { %v1748_v55 = vperm.slane %v1707_v60, %v1747_v29 }
 0x30f   : > { %v1750_v10 = vsel %vm1749_vm3, %v1748_v55, %v1746_v5 }
 0x312   : > { %v1679_v22 = vpop.xlane.xlu2 %1678 }
 0x313   : > { %v1708_v16 = vadd.f32 %v3466_v34, %v1679_v22 }
 0x315   : > { %v1752_v51 = vperm.slane %v1708_v16, %v1751_v40 }
 0x317   : > { %v1754_v24 = vsel %vm1753_vm4, %v1752_v51, %v1750_v10 }
 0x31a   : > { %v1681_v43 = vpop.xlane.xlu2 %1680 }
 0x31b   : > { %v1709_v57 = vadd.f32 %v3466_v34, %v1681_v43 }
 0x31d   : > { %v1756_v45 = vperm.slane %v1709_v57, %v1755_v3 }
 0x31f   : > { %v1758_v21 = vsel %vm1757_vm5, %v1756_v45, %v1754_v24 }
 0x322   : > { %v1683_v26 = vpop.xlane.xlu0 %1682 }
 0x323   : > { %v1710_v4 = vadd.f32 %v3466_v34, %v1683_v26 }
 0x325   : > { %v1760_v38 = vperm.slane %v1710_v4, %v1759_v31 }
 0x327   : > { %v1762_v6 = vsel %vm1761_vm6, %v1760_v38, %v1758_v21 }
 0x32a   : > { %v1685_v49 = vpop.xlane.xlu1 %1684 }
 0x32b   : > { %v1711_v1 = vadd.f32 %v3466_v34, %v1685_v49 }
 0x32d   : > { %v1764_v19 = vperm.slane %v1711_v1, %v1763_v52 }
 0x32f   : > { %v1766_v36 = vsel %vm1765_vm7, %v1764_v19, %v1762_v6 }
 0x332   : > { %v1687_v28 = vpop.xlane.xlu2 %1686 }
 0x333   : > { %v1712_v23 = vadd.f32 %v3466_v34, %v1687_v28 }
 0x335   : > { %v1768_v63 = vperm.slane %v1712_v23, %v1767_v48 }
 0x337   : > { %v1770_v22 = vsel %vm1769_vm8, %v1768_v63, %v1766_v36 }
 0x33a   : > { %v1689_v58 = vpop.xlane.xlu0 %1688 }
 0x33b   : > { %v1713_v15 = vadd.f32 %v3466_v34, %v1689_v58 }
 0x33d   : > { %v1772_v13 = vperm.slane %v1713_v15, %v1771_v46 }
 0x33f   : > { %v1774_v8 = vsel %vm1773_vm9, %v1772_v13, %v1770_v22 }
 0x342   : > { %v1691_v62 = vpop.xlane.xlu1 %1690 }
 0x343   : > { %v1714_v18 = vadd.f32 %v3466_v34, %v1691_v62 }
 0x345   : > { %v1776_v59 = vperm.slane %v1714_v18, %v1775_v56 }
 0x347   : > { %v1778_v26 = vsel %vm1777_vm10, %v1776_v59, %v1774_v8 }
 0x34a   : > { %v1693_v32 = vpop.xlane.xlu2 %1692 }
 0x34b   : > { %v1715_v33 = vadd.f32 %v3466_v34, %v1693_v32 }
 0x34d   : > { %v1780_v61 = vperm.slane %v1715_v33, %v1779_v27 }
 0x34f   : > { %v1782_v50 = vsel %vm1781_vm11, %v1780_v61, %v1778_v26 }
 0x352   : > { %v1695_v9 = vpop.xlane.xlu0 %1694 }
 0x353   : > { %v1716_v12 = vadd.f32 %v3466_v34, %v1695_v9 }
 0x355   : > { %v1784_v30 = vperm.slane %v1716_v12, %v1783_v14 }
 0x357   : > { %v1786_v41 = vsel %vm1785_vm12, %v1784_v30, %v1782_v50 }
 0x35a   : > { %v1697_v20 = vpop.xlane.xlu1 %1696 }
 0x35b   : > { %v1717_v44 = vadd.f32 %v3466_v34, %v1697_v20 }
 0x35d   : > { %v1788_v43 = vperm.slane %v1717_v44, %v1787_v2 }
 0x35f   : > { %v1790_v7 = vsel %vm1789_vm13, %v1788_v43, %v1786_v41 }
 0x362   : > { %v1699_v39 = vpop.xlane.xlu2 %1698 }
 0x363   : > { %v1718_v11 = vadd.f32 %v3466_v34, %v1699_v39 }
 0x365   : > { %v1792_v49 = vperm.slane %v1718_v11, %v1791_v17 }
 0x367   : > { %v1794_v29 = vsel %vm1793_vm14, %v1792_v49, %v1790_v7 }
 0x36a   : > { %v1701_v28 = vpop.xlane.xlu0 %1700 }
 0x36b   : > { %v1719_v42 = vadd.f32 %v3466_v34, %v1701_v28 }
 0x36d   : > { %v1796_v25 = vperm.slane %v1719_v42, %v1795_v0 }
 0x36f   : > { %v1798_v47 = vsel %vm1797_vm15, %v1796_v25, %v1794_v29 }
 0x370   : > { %1800 = vst [vmem:[%s360_s28] sm:$0x1] %v1798_v47 }
 0x371   : > { %2128 = shalt.err (!%p2125_p8)
}
 0x372   : > { %1983 = dma.vmem_to_hbm [thread:$0]  (%p2270_p5), %s1813_s29, 16, %s1815_s8, %s1802_s30  }
 0x373 PF: > { %p2000_p9 = scmp.ge.s32.totalorder %s2171_s14, 2  ;;  %s1826_s25 = sand.u32 1, %s2159_s11  }
 0x374   : > { %s1827_s26 = scalar_lea.sflag [#allocation5], %s1826_s25 }
 0x375   : > { %p1993_p10 = pnand %p2000_p9, %p2274_p6 }
 0x377   : > { %p1994_p11 = pneg %p1993_p10 }
 0x379   : > { %2154 = dma.done.wait (%p1994_p11), %s1827_s26, 16  }
 0x37a   : > { %2156 = vsyncadd (%p1994_p11), %s1827_s26, 4294967280  ;;  %p22_p12 = scmp.ge.s32.totalorder %s2257_s16, 4   ;;  %s3693_s11 = smov %s2163_s12 }
 0x37b   : > { %s3694_s12 = smov %s2167_s13  ;;  %s3695_s13 = smov %s2268_s19 }
 0x37c   : > { %s3696_s14 = smov %s2257_s16  ;;  %24 = sbr.rel (!%p22_p12) target bundleno = 7 (0x7), region = 100 }
 0x381   :  { %1832 = vsyncpa [#allocation4], 1 }
 0x382   :  { %1834 = vsyncpa [#allocation4 + $0x1], 1 }
 0x383   :  { %1835 = vsyncpa [#allocation7], 1 }
 0x384   :  { %1836 = vsyncpa [#allocation5], 1 }
 0x385   :  { %1838 = vsyncpa [#allocation5 + $0x1], 1 }

</bundles_post_ra>
